<compile_context>
chip_gen: v7x
topology: tpu7x:2x2x1
jax: 0.10.0
libtpu: 0.0.40
codegen_flags: <defaults>
</compile_context>

<pallas_src>
import functools

import jax
import jax.numpy as jnp
from jax.experimental import pallas as pl
from jax.experimental.pallas import tpu as pltpu

F32 = jnp.float32
HIDDEN = 32          # width of the two hidden tanh layers of the synthetic network
RHO = 1.0
NU = 0.01
MAX_TILE_N = 1024    # per-step batch cap: ~6-7 MiB live VMEM at this size (safe on all gens)


def _pick_tile(n, max_tile=MAX_TILE_N):
    """Tile size (multiple of 128): as large as possible up to max_tile while
    keeping at least two grid steps when n allows it (v7x megacore sharding)."""
    half = (n + 1) // 2
    t = ((half + 127) // 128) * 128
    return int(max(128, min(max_tile, t)))


def _pinn_kernel(xy_ref, w1t_ref, b1c_ref, w2t_ref, b2c_ref, w3t_ref, b3_ref,
                 out_ref, stk_ref, *, rho, nu):
    """One tile of T collocation points (batch on lanes).

    Derivative channels (each (H, T)):
      [val, d/dx, d/dy, d2/dxx, d2/dxy, d2/dyy, d3/dxxx, d3/dxxy, d3/dxyy, d3/dyyy]
    are written straight into 128-aligned lane slabs of the reused (H, 10*T)
    VMEM scratch `stk_ref` (no concatenate copies) and consumed by one fused
    MXU matmul per layer.
    """
    t = xy_ref.shape[1]
    xrow = xy_ref[0:1, :]                       # (1, T)
    yrow = xy_ref[1:2, :]                       # (1, T)

    # ---- layer 1: K=2 -> pure VPU; derivative structure is known analytically ----
    w1t = w1t_ref[...]                          # (H, 2)
    zx = w1t[:, 0:1]                            # (H, 1)  dz/dx (row-constant)
    zy = w1t[:, 1:2]                            # (H, 1)  dz/dy
    zx2 = zx * zx
    zy2 = zy * zy
    zxzy = zx * zy
    zx3 = zx2 * zx
    zx2zy = zx2 * zy
    zxzy2 = zy2 * zx
    zy3 = zy2 * zy

    z0 = zx * xrow + zy * yrow + b1c_ref[...]   # (H, T)
    f = jnp.tanh(z0)
    f1 = 1.0 - f * f
    f2 = -2.0 * f * f1
    f3 = -2.0 * (f1 * f1 + f * f2)

    # write the 10 channels directly into their lane-aligned scratch slabs
    stk_ref[:, 0 * t:1 * t] = f
    stk_ref[:, 1 * t:2 * t] = f1 * zx
    stk_ref[:, 2 * t:3 * t] = f1 * zy
    stk_ref[:, 3 * t:4 * t] = f2 * zx2
    stk_ref[:, 4 * t:5 * t] = f2 * zxzy
    stk_ref[:, 5 * t:6 * t] = f2 * zy2
    stk_ref[:, 6 * t:7 * t] = f3 * zx3
    stk_ref[:, 7 * t:8 * t] = f3 * zx2zy
    stk_ref[:, 8 * t:9 * t] = f3 * zxzy2
    stk_ref[:, 9 * t:10 * t] = f3 * zy3

    # ---- layer 2: one fused MXU matmul over the 10 stacked channels ----
    z2 = jnp.dot(w2t_ref[...], stk_ref[...], preferred_element_type=F32)   # (H, 10T)

    def blk(a, k):
        return a[:, k * t:(k + 1) * t]

    v0 = blk(z2, 0) + b2c_ref[...]
    zx_, zy_ = blk(z2, 1), blk(z2, 2)
    zxx, zxy, zyy = blk(z2, 3), blk(z2, 4), blk(z2, 5)
    zxxx, zxxy, zxyy, zyyy = blk(z2, 6), blk(z2, 7), blk(z2, 8), blk(z2, 9)

    g = jnp.tanh(v0)
    g1 = 1.0 - g * g
    g2 = -2.0 * g * g1
    g3 = -2.0 * (g1 * g1 + g * g2)
    # explicit CSE of shared products (compiler does not reliably CSE long chains)
    sxx = zx_ * zx_
    syy = zy_ * zy_
    sxy = zx_ * zy_
    g2zx = g2 * zx_
    g2zy = g2 * zy_

    # layer-2 composed derivative channels overwrite the same scratch slabs
    stk_ref[:, 0 * t:1 * t] = g
    stk_ref[:, 1 * t:2 * t] = g1 * zx_
    stk_ref[:, 2 * t:3 * t] = g1 * zy_
    stk_ref[:, 3 * t:4 * t] = g2 * sxx + g1 * zxx
    stk_ref[:, 4 * t:5 * t] = g2 * sxy + g1 * zxy
    stk_ref[:, 5 * t:6 * t] = g2 * syy + g1 * zyy
    stk_ref[:, 6 * t:7 * t] = g3 * (sxx * zx_) + 3.0 * g2zx * zxx + g1 * zxxx
    stk_ref[:, 7 * t:8 * t] = (g3 * (sxx * zy_) + 2.0 * g2zx * zxy
                               + g2zy * zxx + g1 * zxxy)
    stk_ref[:, 8 * t:9 * t] = (g3 * (syy * zx_) + 2.0 * g2zy * zxy
                               + g2zx * zyy + g1 * zxyy)
    stk_ref[:, 9 * t:10 * t] = g3 * (syy * zy_) + 3.0 * g2zy * zyy + g1 * zyyy

    # ---- layer 3: single (2,H) x (H,10T) contraction -> psi column + p column ----
    out3 = jnp.dot(w3t_ref[...], stk_ref[...], preferred_element_type=F32)  # (2, 10T)
    psi_row = out3[0:1, :]
    p_row = out3[1:2, :]

    psi = psi_row[:, 0:t] + b3_ref[0:1, 0:1]       # only the value channel gets bias
    psi_x = psi_row[:, 1 * t:2 * t]
    psi_y = psi_row[:, 2 * t:3 * t]
    psi_xx = psi_row[:, 3 * t:4 * t]
    psi_xy = psi_row[:, 4 * t:5 * t]
    psi_yy = psi_row[:, 5 * t:6 * t]
    psi_xxx = psi_row[:, 6 * t:7 * t]
    psi_xxy = psi_row[:, 7 * t:8 * t]
    psi_xyy = psi_row[:, 8 * t:9 * t]
    psi_yyy = psi_row[:, 9 * t:10 * t]
    p_x = p_row[:, 1 * t:2 * t]
    p_y = p_row[:, 2 * t:3 * t]

    # stream-function formulation: u = psi_y, v = -psi_x  (lane-dense epilogue)
    u = psi_y
    vv = -psi_x
    u_x, u_y = psi_xy, psi_yy
    u_xx, u_yy = psi_xxy, psi_yyy
    v_x, v_y = -psi_xx, -psi_xy
    v_xx, v_yy = -psi_xxx, -psi_xyy

    u_eqn = rho * (u * u_x + vv * u_y) + p_x - nu * (u_xx + u_yy)
    v_eqn = rho * (u * v_x + vv * v_y) + p_y - nu * (v_xx + v_yy)

    # direct lane-dense row stores (no (8, T) concatenate / temporary)
    out_ref[0:1, :] = psi
    out_ref[1:2, :] = u
    out_ref[2:3, :] = vv
    out_ref[3:4, :] = u_eqn
    out_ref[4:5, :] = v_eqn
    out_ref[5:6, :] = p_x
    out_ref[6:7, :] = p_y
    out_ref[7:8, :] = psi        # filler row so the whole (8, T) tile is written


def pinn_apply(xy, params, rho=RHO, nu=NU, tile=None):
    """Evaluates psi, (u, v) and the NS residuals for a batch of points (N, 2)."""
    w1, b1, w2, b2, w3, b3 = params
    hidden = w1.shape[1]
    n = xy.shape[0]
    if tile is None:
        tile = _pick_tile(n)
    assert tile % 128 == 0, "tile must be a multiple of 128 for lane-dense I/O"

    n_pad = ((n + tile - 1) // tile) * tile
    grid_n = n_pad // tile
    xyt = jnp.zeros((2, n_pad), F32).at[:, :n].set(jnp.transpose(xy.astype(F32)))

    # advisory cost hint for XLA scheduling around the custom call
    flops_per_pt = 2 * hidden * hidden * 10 + 2 * 2 * hidden * 10 + 120 * hidden
    weight_bytes = 4 * (2 * hidden + hidden + hidden * hidden + hidden + 2 * hidden + 2)
    cost = pl.CostEstimate(
        flops=int(n_pad * flops_per_pt),
        transcendentals=int(n_pad * 2 * hidden),
        bytes_accessed=int(n_pad * (2 + 8) * 4 + grid_n * weight_bytes),
    )

    kernel = functools.partial(_pinn_kernel, rho=float(rho), nu=float(nu))
    out = pl.pallas_call(
        kernel,
        out_shape=jax.ShapeDtypeStruct((8, n_pad), F32),
        grid=(grid_n,),
        in_specs=[
            pl.BlockSpec((2, tile), lambda i: (0, i)),          # xy (transposed)
            pl.BlockSpec((hidden, 2), lambda i: (0, 0)),        # w1^T (resident)
            pl.BlockSpec((hidden, 1), lambda i: (0, 0)),        # b1 (column)
            pl.BlockSpec((hidden, hidden), lambda i: (0, 0)),   # w2^T
            pl.BlockSpec((hidden, 1), lambda i: (0, 0)),        # b2 (column)
            pl.BlockSpec((2, hidden), lambda i: (0, 0)),        # w3^T
            pl.BlockSpec((1, 2), lambda i: (0, 0)),             # b3
        ],
        out_specs=pl.BlockSpec((8, tile), lambda i: (0, i)),
        scratch_shapes=[pltpu.VMEM((hidden, 10 * tile), F32)],  # reused channel stack
        compiler_params=pltpu.CompilerParams(
            dimension_semantics=("parallel",),
            vmem_limit_bytes=32 * 1024 * 1024),
        cost_estimate=cost,
    )(xyt, jnp.transpose(w1), jnp.transpose(b1), jnp.transpose(w2),
      jnp.transpose(b2), jnp.transpose(w3), b3)

    psi = jnp.transpose(out[0:1, :n])      # (n, 1)
    uv = jnp.transpose(out[1:3, :n])       # (n, 2) = (u, v)
    res = jnp.transpose(out[3:5, :n])      # (n, 2) = (u_eqn, v_eqn)
    return psi, uv, res


def pinn_forward(xy_eqn, xy_bnd, params, rho=RHO, nu=NU):
    """Mirrors PINN.forward: returns (uv_eqn, psi_bnd, uv_bnd).  One fused kernel call."""
    n_e = xy_eqn.shape[0]
    xy_all = jnp.concatenate([xy_eqn.astype(F32), xy_bnd.astype(F32)], axis=0)
    psi, uv, res = pinn_apply(xy_all, params, rho, nu)
    uv_eqn = res[:n_e]                                       # column_stack(u_eqn, v_eqn)
    psi_b = psi[n_e:]
    psi_bnd = jnp.concatenate([psi_b, psi_b], axis=1)        # column_stack([psi, psi])
    uv_bnd = uv[n_e:]                                        # column_stack(u_bnd, v_bnd)
    return uv_eqn, psi_bnd, uv_bnd


def init_params(key, hidden=HIDDEN):
    """Deterministic synthetic MLP: 2 -> hidden -> hidden -> 2 (psi, p)."""
    k1, k2, k3 = jax.random.split(key, 3)
    w1 = (jax.random.normal(k1, (2, hidden), F32) / jnp.sqrt(2.0)).astype(F32)
    b1 = jnp.zeros((1, hidden), F32)
    w2 = (jax.random.normal(k2, (hidden, hidden), F32) / jnp.sqrt(float(hidden))).astype(F32)
    b2 = jnp.zeros((1, hidden), F32)
    w3 = (jax.random.normal(k3, (hidden, 2), F32) / jnp.sqrt(float(hidden))).astype(F32)
    b3 = jnp.zeros((1, 2), F32)
    return (w1, b1, w2, b2, w3, b3)


def _reference_forward(xy, params, rho=RHO, nu=NU):
    """Straightforward pure-JAX forward-mode reference (batch-major layout)."""
    w1, b1, w2, b2, w3, b3 = params
    xy = xy.astype(F32)
    n = xy.shape[0]
    hp = jax.lax.Precision.HIGHEST
    ones = jnp.ones((n, 1), F32)
    zer1 = jnp.zeros((n, 1), F32)
    zer2 = jnp.zeros((n, 2), F32)
    dx0 = jnp.concatenate([ones, zer1], axis=1)
    dy0 = jnp.concatenate([zer1, ones], axis=1)
    chans = [xy, dx0, dy0] + [zer2] * 7

    def linear(ch, w, b):
        out = [jnp.dot(c, w, precision=hp) for c in ch]
        out[0] = out[0] + b
        return out

    def compose(z):
        v, zx, zy, zxx, zxy, zyy, zxxx, zxxy, zxyy, zyyy = z
        f = jnp.tanh(v)
        f1 = 1.0 - f * f
        f2 = -2.0 * f * f1
        f3 = -2.0 * f1 * f1 - 2.0 * f * f2
        ax = f1 * zx
        ay = f1 * zy
        axx = f2 * zx * zx + f1 * zxx
        axy = f2 * zx * zy + f1 * zxy
        ayy = f2 * zy * zy + f1 * zyy
        axxx = f3 * zx * zx * zx + 3.0 * f2 * zx * zxx + f1 * zxxx
        axxy = f3 * zx * zx * zy + f2 * (2.0 * zx * zxy + zy * zxx) + f1 * zxxy
        axyy = f3 * zx * zy * zy + f2 * (2.0 * zy * zxy + zx * zyy) + f1 * zxyy
        ayyy = f3 * zy * zy * zy + 3.0 * f2 * zy * zyy + f1 * zyyy
        return [f, ax, ay, axx, axy, ayy, axxx, axxy, axyy, ayyy]

    chans = compose(linear(chans, w1, b1))
    chans = compose(linear(chans, w2, b2))
    chans = linear(chans, w3, b3)

    def col(c, j):
        return c[:, j:j + 1]

    psi = col(chans[0], 0)
    p_x, p_y = col(chans[1], 1), col(chans[2], 1)
    psi_x, psi_y = col(chans[1], 0), col(chans[2], 0)
    psi_xx, psi_xy, psi_yy = col(chans[3], 0), col(chans[4], 0), col(chans[5], 0)
    psi_xxx, psi_xxy = col(chans[6], 0), col(chans[7], 0)
    psi_xyy, psi_yyy = col(chans[8], 0), col(chans[9], 0)

    u = psi_y
    v = -psi_x
    u_x, u_y, u_xx, u_yy = psi_xy, psi_yy, psi_xxy, psi_yyy
    v_x, v_y, v_xx, v_yy = -psi_xx, -psi_xy, -psi_xxx, -psi_xyy
    u_eqn = rho * (u * u_x + v * u_y) + p_x - nu * (u_xx + u_yy)
    v_eqn = rho * (u * v_x + v * v_y) + p_y - nu * (v_xx + v_yy)
    return psi, jnp.concatenate([u, v], axis=1), jnp.concatenate([u_eqn, v_eqn], axis=1)


if __name__ == "__main__":
    key = jax.random.PRNGKey(0)
    k_par, k_eqn, k_bnd = jax.random.split(key, 3)

    params = init_params(k_par)
    xy_eqn = jax.random.uniform(k_eqn, (16, 2), F32)   # interior collocation points
    xy_bnd = jax.random.uniform(k_bnd, (8, 2), F32)    # boundary points

    uv_eqn, psi_bnd, uv_bnd = pinn_forward(xy_eqn, xy_bnd, params)
    jax.block_until_ready((uv_eqn, psi_bnd, uv_bnd))

    assert uv_eqn.shape == (16, 2)
    assert psi_bnd.shape == (8, 2)
    assert uv_bnd.shape == (8, 2)

    # cross-check the fused/transposed kernel against the straightforward reference
    _, _, res_e_ref = _reference_forward(xy_eqn, params)
    psi_b_ref, uv_b_ref, _ = _reference_forward(xy_bnd, params)
    assert jnp.allclose(uv_eqn, res_e_ref, rtol=5e-3, atol=5e-3)
    assert jnp.allclose(psi_bnd, jnp.concatenate([psi_b_ref, psi_b_ref], axis=1),
                        rtol=5e-3, atol=5e-3)
    assert jnp.allclose(uv_bnd, uv_b_ref, rtol=5e-3, atol=5e-3)

    print("KERNEL_OK")
</pallas_src>

<mosaic_0001>
module attributes {stable_mosaic.version = 11 : i64} {
  func.func @_pinn_kernel(%arg0: i32, %arg1: memref<2x128xf32, #tpu.memory_space<vmem>>, %arg2: memref<32x2xf32, #tpu.memory_space<vmem>>, %arg3: memref<32x1xf32, #tpu.memory_space<vmem>>, %arg4: memref<32x32xf32, #tpu.memory_space<vmem>>, %arg5: memref<32x1xf32, #tpu.memory_space<vmem>>, %arg6: memref<2x32xf32, #tpu.memory_space<vmem>>, %arg7: memref<1x2xf32, #tpu.memory_space<vmem>>, %arg8: memref<8x128xf32, #tpu.memory_space<vmem>>, %arg9: memref<32x1280xf32, #tpu.memory_space<vmem>>) attributes {dimension_semantics = [#tpu.dimension_semantics<parallel>], iteration_bounds = array<i64: 1>, scalar_prefetch = 0 : i64, scratch_operands = 1 : i64, tpu.core_type = #tpu.core_type<tc>, window_params = [{transform_indices = @transform_0, window_bounds = array<i64: 2, 128>}, {pipeline_mode = #tpu.pipeline_mode<synchronous>, transform_indices = @transform_1, window_bounds = array<i64: 32, 2>}, {pipeline_mode = #tpu.pipeline_mode<synchronous>, transform_indices = @transform_2, window_bounds = array<i64: 32, 1>}, {pipeline_mode = #tpu.pipeline_mode<synchronous>, transform_indices = @transform_3, window_bounds = array<i64: 32, 32>}, {pipeline_mode = #tpu.pipeline_mode<synchronous>, transform_indices = @transform_4, window_bounds = array<i64: 32, 1>}, {pipeline_mode = #tpu.pipeline_mode<synchronous>, transform_indices = @transform_5, window_bounds = array<i64: 2, 32>}, {pipeline_mode = #tpu.pipeline_mode<synchronous>, transform_indices = @transform_6, window_bounds = array<i64: 1, 2>}, {transform_indices = @transform_7, window_bounds = array<i64: 8, 128>}]} {
    %c0 = arith.constant 0 : index
    %c0_0 = arith.constant 0 : index
    %0 = vector.load %arg1[%c0, %c0_0] : memref<2x128xf32, #tpu.memory_space<vmem>>, vector<1x128xf32>
    %c1 = arith.constant 1 : index
    %c0_1 = arith.constant 0 : index
    %1 = vector.load %arg1[%c1, %c0_1] : memref<2x128xf32, #tpu.memory_space<vmem>>, vector<1x128xf32>
    %c0_2 = arith.constant 0 : index
    %c0_3 = arith.constant 0 : index
    %2 = vector.load %arg2[%c0_2, %c0_3] : memref<32x2xf32, #tpu.memory_space<vmem>>, vector<32x2xf32>
    %3 = vector.extract_strided_slice %2 {offsets = [0, 0], sizes = [32, 1], strides = [1, 1]} : vector<32x2xf32> to vector<32x1xf32>
    %4 = vector.extract_strided_slice %2 {offsets = [0, 1], sizes = [32, 1], strides = [1, 1]} : vector<32x2xf32> to vector<32x1xf32>
    %5 = arith.mulf %3, %3 : vector<32x1xf32>
    %6 = arith.mulf %4, %4 : vector<32x1xf32>
    %7 = arith.mulf %3, %4 : vector<32x1xf32>
    %8 = arith.mulf %5, %3 : vector<32x1xf32>
    %9 = arith.mulf %5, %4 : vector<32x1xf32>
    %10 = arith.mulf %6, %3 : vector<32x1xf32>
    %11 = arith.mulf %6, %4 : vector<32x1xf32>
    %12 = vector.broadcast %3 : vector<32x1xf32> to vector<32x128xf32>
    %13 = vector.broadcast %0 : vector<1x128xf32> to vector<32x128xf32>
    %14 = arith.mulf %12, %13 : vector<32x128xf32>
    %15 = vector.broadcast %4 : vector<32x1xf32> to vector<32x128xf32>
    %16 = vector.broadcast %1 : vector<1x128xf32> to vector<32x128xf32>
    %17 = arith.mulf %15, %16 : vector<32x128xf32>
    %18 = arith.addf %14, %17 : vector<32x128xf32>
    %c0_4 = arith.constant 0 : index
    %c0_5 = arith.constant 0 : index
    %19 = vector.load %arg3[%c0_4, %c0_5] : memref<32x1xf32, #tpu.memory_space<vmem>>, vector<32x1xf32>
    %20 = vector.broadcast %19 : vector<32x1xf32> to vector<32x128xf32>
    %21 = arith.addf %18, %20 : vector<32x128xf32>
    %22 = math.tanh %21 : vector<32x128xf32>
    %23 = arith.mulf %22, %22 : vector<32x128xf32>
    %cst = arith.constant 1.000000e+00 : f32
    %24 = vector.broadcast %cst : f32 to vector<32x128xf32>
    %25 = arith.subf %24, %23 : vector<32x128xf32>
    %cst_6 = arith.constant -2.000000e+00 : f32
    %26 = vector.broadcast %cst_6 : f32 to vector<32x128xf32>
    %27 = arith.mulf %26, %22 : vector<32x128xf32>
    %28 = arith.mulf %27, %25 : vector<32x128xf32>
    %29 = arith.mulf %25, %25 : vector<32x128xf32>
    %30 = arith.mulf %22, %28 : vector<32x128xf32>
    %31 = arith.addf %29, %30 : vector<32x128xf32>
    %cst_7 = arith.constant -2.000000e+00 : f32
    %32 = vector.broadcast %cst_7 : f32 to vector<32x128xf32>
    %33 = arith.mulf %32, %31 : vector<32x128xf32>
    %c0_8 = arith.constant 0 : index
    %c0_9 = arith.constant 0 : index
    %34 = vector.load %arg9[%c0_8, %c0_9] : memref<32x1280xf32, #tpu.memory_space<vmem>>, vector<32x128xf32>
    tpu.vector_store %arg9[%c0_8, %c0_9], %22 {strides = array<i32>} : memref<32x1280xf32, #tpu.memory_space<vmem>>, vector<32x128xf32>,
    %35 = vector.broadcast %3 : vector<32x1xf32> to vector<32x128xf32>
    %36 = arith.mulf %25, %35 : vector<32x128xf32>
    %c0_10 = arith.constant 0 : index
    %c128 = arith.constant 128 : index
    %37 = vector.load %arg9[%c0_10, %c128] : memref<32x1280xf32, #tpu.memory_space<vmem>>, vector<32x128xf32>
    tpu.vector_store %arg9[%c0_10, %c128], %36 {strides = array<i32>} : memref<32x1280xf32, #tpu.memory_space<vmem>>, vector<32x128xf32>,
    %38 = vector.broadcast %4 : vector<32x1xf32> to vector<32x128xf32>
    %39 = arith.mulf %25, %38 : vector<32x128xf32>
    %c0_11 = arith.constant 0 : index
    %c256 = arith.constant 256 : index
    %40 = vector.load %arg9[%c0_11, %c256] : memref<32x1280xf32, #tpu.memory_space<vmem>>, vector<32x128xf32>
    tpu.vector_store %arg9[%c0_11, %c256], %39 {strides = array<i32>} : memref<32x1280xf32, #tpu.memory_space<vmem>>, vector<32x128xf32>,
    %41 = vector.broadcast %5 : vector<32x1xf32> to vector<32x128xf32>
    %42 = arith.mulf %28, %41 : vector<32x128xf32>
    %c0_12 = arith.constant 0 : index
    %c384 = arith.constant 384 : index
    %43 = vector.load %arg9[%c0_12, %c384] : memref<32x1280xf32, #tpu.memory_space<vmem>>, vector<32x128xf32>
    tpu.vector_store %arg9[%c0_12, %c384], %42 {strides = array<i32>} : memref<32x1280xf32, #tpu.memory_space<vmem>>, vector<32x128xf32>,
    %44 = vector.broadcast %7 : vector<32x1xf32> to vector<32x128xf32>
    %45 = arith.mulf %28, %44 : vector<32x128xf32>
    %c0_13 = arith.constant 0 : index
    %c512 = arith.constant 512 : index
    %46 = vector.load %arg9[%c0_13, %c512] : memref<32x1280xf32, #tpu.memory_space<vmem>>, vector<32x128xf32>
    tpu.vector_store %arg9[%c0_13, %c512], %45 {strides = array<i32>} : memref<32x1280xf32, #tpu.memory_space<vmem>>, vector<32x128xf32>,
    %47 = vector.broadcast %6 : vector<32x1xf32> to vector<32x128xf32>
    %48 = arith.mulf %28, %47 : vector<32x128xf32>
    %c0_14 = arith.constant 0 : index
    %c640 = arith.constant 640 : index
    %49 = vector.load %arg9[%c0_14, %c640] : memref<32x1280xf32, #tpu.memory_space<vmem>>, vector<32x128xf32>
    tpu.vector_store %arg9[%c0_14, %c640], %48 {strides = array<i32>} : memref<32x1280xf32, #tpu.memory_space<vmem>>, vector<32x128xf32>,
    %50 = vector.broadcast %8 : vector<32x1xf32> to vector<32x128xf32>
    %51 = arith.mulf %33, %50 : vector<32x128xf32>
    %c0_15 = arith.constant 0 : index
    %c768 = arith.constant 768 : index
    %52 = vector.load %arg9[%c0_15, %c768] : memref<32x1280xf32, #tpu.memory_space<vmem>>, vector<32x128xf32>
    tpu.vector_store %arg9[%c0_15, %c768], %51 {strides = array<i32>} : memref<32x1280xf32, #tpu.memory_space<vmem>>, vector<32x128xf32>,
    %53 = vector.broadcast %9 : vector<32x1xf32> to vector<32x128xf32>
    %54 = arith.mulf %33, %53 : vector<32x128xf32>
    %c0_16 = arith.constant 0 : index
    %c896 = arith.constant 896 : index
    %55 = vector.load %arg9[%c0_16, %c896] : memref<32x1280xf32, #tpu.memory_space<vmem>>, vector<32x128xf32>
    tpu.vector_store %arg9[%c0_16, %c896], %54 {strides = array<i32>} : memref<32x1280xf32, #tpu.memory_space<vmem>>, vector<32x128xf32>,
    %56 = vector.broadcast %10 : vector<32x1xf32> to vector<32x128xf32>
    %57 = arith.mulf %33, %56 : vector<32x128xf32>
    %c0_17 = arith.constant 0 : index
    %c1024 = arith.constant 1024 : index
    %58 = vector.load %arg9[%c0_17, %c1024] : memref<32x1280xf32, #tpu.memory_space<vmem>>, vector<32x128xf32>
    tpu.vector_store %arg9[%c0_17, %c1024], %57 {strides = array<i32>} : memref<32x1280xf32, #tpu.memory_space<vmem>>, vector<32x128xf32>,
    %59 = vector.broadcast %11 : vector<32x1xf32> to vector<32x128xf32>
    %60 = arith.mulf %33, %59 : vector<32x128xf32>
    %c0_18 = arith.constant 0 : index
    %c1152 = arith.constant 1152 : index
    %61 = vector.load %arg9[%c0_18, %c1152] : memref<32x1280xf32, #tpu.memory_space<vmem>>, vector<32x128xf32>
    tpu.vector_store %arg9[%c0_18, %c1152], %60 {strides = array<i32>} : memref<32x1280xf32, #tpu.memory_space<vmem>>, vector<32x128xf32>,
    %c0_19 = arith.constant 0 : index
    %c0_20 = arith.constant 0 : index
    %62 = vector.load %arg4[%c0_19, %c0_20] : memref<32x32xf32, #tpu.memory_space<vmem>>, vector<32x32xf32>
    %c0_21 = arith.constant 0 : index
    %c0_22 = arith.constant 0 : index
    %63 = vector.load %arg9[%c0_21, %c0_22] : memref<32x1280xf32, #tpu.memory_space<vmem>>, vector<32x1280xf32>
    %cst_23 = arith.constant dense<0.000000e+00> : vector<32x1280xf32>
    %64 = tpu.matmul %62, %63, %cst_23 {dimension_numbers = #tpu.dot_dimension_numbers<[1], [0], [0], [1], [0, 0, 1, 1], [], []>} : vector<32x32xf32>, vector<32x1280xf32>, vector<32x1280xf32> -> vector<32x1280xf32>
    %65 = vector.extract_strided_slice %64 {offsets = [0, 0], sizes = [32, 128], strides = [1, 1]} : vector<32x1280xf32> to vector<32x128xf32>
    %c0_24 = arith.constant 0 : index
    %c0_25 = arith.constant 0 : index
    %66 = vector.load %arg5[%c0_24, %c0_25] : memref<32x1xf32, #tpu.memory_space<vmem>>, vector<32x1xf32>
    %67 = vector.broadcast %66 : vector<32x1xf32> to vector<32x128xf32>
    %68 = arith.addf %65, %67 : vector<32x128xf32>
    %69 = vector.extract_strided_slice %64 {offsets = [0, 128], sizes = [32, 128], strides = [1, 1]} : vector<32x1280xf32> to vector<32x128xf32>
    %70 = vector.extract_strided_slice %64 {offsets = [0, 256], sizes = [32, 128], strides = [1, 1]} : vector<32x1280xf32> to vector<32x128xf32>
    %71 = vector.extract_strided_slice %64 {offsets = [0, 384], sizes = [32, 128], strides = [1, 1]} : vector<32x1280xf32> to vector<32x128xf32>
    %72 = vector.extract_strided_slice %64 {offsets = [0, 512], sizes = [32, 128], strides = [1, 1]} : vector<32x1280xf32> to vector<32x128xf32>
    %73 = vector.extract_strided_slice %64 {offsets = [0, 640], sizes = [32, 128], strides = [1, 1]} : vector<32x1280xf32> to vector<32x128xf32>
    %74 = vector.extract_strided_slice %64 {offsets = [0, 768], sizes = [32, 128], strides = [1, 1]} : vector<32x1280xf32> to vector<32x128xf32>
    %75 = vector.extract_strided_slice %64 {offsets = [0, 896], sizes = [32, 128], strides = [1, 1]} : vector<32x1280xf32> to vector<32x128xf32>
    %76 = vector.extract_strided_slice %64 {offsets = [0, 1024], sizes = [32, 128], strides = [1, 1]} : vector<32x1280xf32> to vector<32x128xf32>
    %77 = vector.extract_strided_slice %64 {offsets = [0, 1152], sizes = [32, 128], strides = [1, 1]} : vector<32x1280xf32> to vector<32x128xf32>
    %78 = math.tanh %68 : vector<32x128xf32>
    %79 = arith.mulf %78, %78 : vector<32x128xf32>
    %cst_26 = arith.constant 1.000000e+00 : f32
    %80 = vector.broadcast %cst_26 : f32 to vector<32x128xf32>
    %81 = arith.subf %80, %79 : vector<32x128xf32>
    %cst_27 = arith.constant -2.000000e+00 : f32
    %82 = vector.broadcast %cst_27 : f32 to vector<32x128xf32>
    %83 = arith.mulf %82, %78 : vector<32x128xf32>
    %84 = arith.mulf %83, %81 : vector<32x128xf32>
    %85 = arith.mulf %81, %81 : vector<32x128xf32>
    %86 = arith.mulf %78, %84 : vector<32x128xf32>
    %87 = arith.addf %85, %86 : vector<32x128xf32>
    %cst_28 = arith.constant -2.000000e+00 : f32
    %88 = vector.broadcast %cst_28 : f32 to vector<32x128xf32>
    %89 = arith.mulf %88, %87 : vector<32x128xf32>
    %90 = arith.mulf %69, %69 : vector<32x128xf32>
    %91 = arith.mulf %70, %70 : vector<32x128xf32>
    %92 = arith.mulf %69, %70 : vector<32x128xf32>
    %93 = arith.mulf %84, %69 : vector<32x128xf32>
    %94 = arith.mulf %84, %70 : vector<32x128xf32>
    %c0_29 = arith.constant 0 : index
    %c0_30 = arith.constant 0 : index
    %95 = vector.load %arg9[%c0_29, %c0_30] : memref<32x1280xf32, #tpu.memory_space<vmem>>, vector<32x128xf32>
    tpu.vector_store %arg9[%c0_29, %c0_30], %78 {strides = array<i32>} : memref<32x1280xf32, #tpu.memory_space<vmem>>, vector<32x128xf32>,
    %96 = arith.mulf %81, %69 : vector<32x128xf32>
    %c0_31 = arith.constant 0 : index
    %c128_32 = arith.constant 128 : index
    %97 = vector.load %arg9[%c0_31, %c128_32] : memref<32x1280xf32, #tpu.memory_space<vmem>>, vector<32x128xf32>
    tpu.vector_store %arg9[%c0_31, %c128_32], %96 {strides = array<i32>} : memref<32x1280xf32, #tpu.memory_space<vmem>>, vector<32x128xf32>,
    %98 = arith.mulf %81, %70 : vector<32x128xf32>
    %c0_33 = arith.constant 0 : index
    %c256_34 = arith.constant 256 : index
    %99 = vector.load %arg9[%c0_33, %c256_34] : memref<32x1280xf32, #tpu.memory_space<vmem>>, vector<32x128xf32>
    tpu.vector_store %arg9[%c0_33, %c256_34], %98 {strides = array<i32>} : memref<32x1280xf32, #tpu.memory_space<vmem>>, vector<32x128xf32>,
    %100 = arith.mulf %84, %90 : vector<32x128xf32>
    %101 = arith.mulf %81, %71 : vector<32x128xf32>
    %102 = arith.addf %100, %101 : vector<32x128xf32>
    %c0_35 = arith.constant 0 : index
    %c384_36 = arith.constant 384 : index
    %103 = vector.load %arg9[%c0_35, %c384_36] : memref<32x1280xf32, #tpu.memory_space<vmem>>, vector<32x128xf32>
    tpu.vector_store %arg9[%c0_35, %c384_36], %102 {strides = array<i32>} : memref<32x1280xf32, #tpu.memory_space<vmem>>, vector<32x128xf32>,
    %104 = arith.mulf %84, %92 : vector<32x128xf32>
    %105 = arith.mulf %81, %72 : vector<32x128xf32>
    %106 = arith.addf %104, %105 : vector<32x128xf32>
    %c0_37 = arith.constant 0 : index
    %c512_38 = arith.constant 512 : index
    %107 = vector.load %arg9[%c0_37, %c512_38] : memref<32x1280xf32, #tpu.memory_space<vmem>>, vector<32x128xf32>
    tpu.vector_store %arg9[%c0_37, %c512_38], %106 {strides = array<i32>} : memref<32x1280xf32, #tpu.memory_space<vmem>>, vector<32x128xf32>,
    %108 = arith.mulf %84, %91 : vector<32x128xf32>
    %109 = arith.mulf %81, %73 : vector<32x128xf32>
    %110 = arith.addf %108, %109 : vector<32x128xf32>
    %c0_39 = arith.constant 0 : index
    %c640_40 = arith.constant 640 : index
    %111 = vector.load %arg9[%c0_39, %c640_40] : memref<32x1280xf32, #tpu.memory_space<vmem>>, vector<32x128xf32>
    tpu.vector_store %arg9[%c0_39, %c640_40], %110 {strides = array<i32>} : memref<32x1280xf32, #tpu.memory_space<vmem>>, vector<32x128xf32>,
    %112 = arith.mulf %90, %69 : vector<32x128xf32>
    %113 = arith.mulf %89, %112 : vector<32x128xf32>
    %cst_41 = arith.constant 3.000000e+00 : f32
    %114 = vector.broadcast %cst_41 : f32 to vector<32x128xf32>
    %115 = arith.mulf %114, %93 : vector<32x128xf32>
    %116 = arith.mulf %115, %71 : vector<32x128xf32>
    %117 = arith.addf %113, %116 : vector<32x128xf32>
    %118 = arith.mulf %81, %74 : vector<32x128xf32>
    %119 = arith.addf %117, %118 : vector<32x128xf32>
    %c0_42 = arith.constant 0 : index
    %c768_43 = arith.constant 768 : index
    %120 = vector.load %arg9[%c0_42, %c768_43] : memref<32x1280xf32, #tpu.memory_space<vmem>>, vector<32x128xf32>
    tpu.vector_store %arg9[%c0_42, %c768_43], %119 {strides = array<i32>} : memref<32x1280xf32, #tpu.memory_space<vmem>>, vector<32x128xf32>,
    %121 = arith.mulf %90, %70 : vector<32x128xf32>
    %122 = arith.mulf %89, %121 : vector<32x128xf32>
    %cst_44 = arith.constant 2.000000e+00 : f32
    %123 = vector.broadcast %cst_44 : f32 to vector<32x128xf32>
    %124 = arith.mulf %123, %93 : vector<32x128xf32>
    %125 = arith.mulf %124, %72 : vector<32x128xf32>
    %126 = arith.addf %122, %125 : vector<32x128xf32>
    %127 = arith.mulf %94, %71 : vector<32x128xf32>
    %128 = arith.addf %126, %127 : vector<32x128xf32>
    %129 = arith.mulf %81, %75 : vector<32x128xf32>
    %130 = arith.addf %128, %129 : vector<32x128xf32>
    %c0_45 = arith.constant 0 : index
    %c896_46 = arith.constant 896 : index
    %131 = vector.load %arg9[%c0_45, %c896_46] : memref<32x1280xf32, #tpu.memory_space<vmem>>, vector<32x128xf32>
    tpu.vector_store %arg9[%c0_45, %c896_46], %130 {strides = array<i32>} : memref<32x1280xf32, #tpu.memory_space<vmem>>, vector<32x128xf32>,
    %132 = arith.mulf %91, %69 : vector<32x128xf32>
    %133 = arith.mulf %89, %132 : vector<32x128xf32>
    %cst_47 = arith.constant 2.000000e+00 : f32
    %134 = vector.broadcast %cst_47 : f32 to vector<32x128xf32>
    %135 = arith.mulf %134, %94 : vector<32x128xf32>
    %136 = arith.mulf %135, %72 : vector<32x128xf32>
    %137 = arith.addf %133, %136 : vector<32x128xf32>
    %138 = arith.mulf %93, %73 : vector<32x128xf32>
    %139 = arith.addf %137, %138 : vector<32x128xf32>
    %140 = arith.mulf %81, %76 : vector<32x128xf32>
    %141 = arith.addf %139, %140 : vector<32x128xf32>
    %c0_48 = arith.constant 0 : index
    %c1024_49 = arith.constant 1024 : index
    %142 = vector.load %arg9[%c0_48, %c1024_49] : memref<32x1280xf32, #tpu.memory_space<vmem>>, vector<32x128xf32>
    tpu.vector_store %arg9[%c0_48, %c1024_49], %141 {strides = array<i32>} : memref<32x1280xf32, #tpu.memory_space<vmem>>, vector<32x128xf32>,
    %143 = arith.mulf %91, %70 : vector<32x128xf32>
    %144 = arith.mulf %89, %143 : vector<32x128xf32>
    %cst_50 = arith.constant 3.000000e+00 : f32
    %145 = vector.broadcast %cst_50 : f32 to vector<32x128xf32>
    %146 = arith.mulf %145, %94 : vector<32x128xf32>
    %147 = arith.mulf %146, %73 : vector<32x128xf32>
    %148 = arith.addf %144, %147 : vector<32x128xf32>
    %149 = arith.mulf %81, %77 : vector<32x128xf32>
    %150 = arith.addf %148, %149 : vector<32x128xf32>
    %c0_51 = arith.constant 0 : index
    %c1152_52 = arith.constant 1152 : index
    %151 = vector.load %arg9[%c0_51, %c1152_52] : memref<32x1280xf32, #tpu.memory_space<vmem>>, vector<32x128xf32>
    tpu.vector_store %arg9[%c0_51, %c1152_52], %150 {strides = array<i32>} : memref<32x1280xf32, #tpu.memory_space<vmem>>, vector<32x128xf32>,
    %c0_53 = arith.constant 0 : index
    %c0_54 = arith.constant 0 : index
    %152 = vector.load %arg6[%c0_53, %c0_54] : memref<2x32xf32, #tpu.memory_space<vmem>>, vector<2x32xf32>
    %c0_55 = arith.constant 0 : index
    %c0_56 = arith.constant 0 : index
    %153 = vector.load %arg9[%c0_55, %c0_56] : memref<32x1280xf32, #tpu.memory_space<vmem>>, vector<32x1280xf32>
    %cst_57 = arith.constant dense<0.000000e+00> : vector<2x1280xf32>
    %154 = tpu.matmul %152, %153, %cst_57 {dimension_numbers = #tpu.dot_dimension_numbers<[1], [0], [0], [1], [0, 0, 1, 1], [], []>} : vector<2x32xf32>, vector<32x1280xf32>, vector<2x1280xf32> -> vector<2x1280xf32>
    %155 = vector.extract_strided_slice %154 {offsets = [0, 0], sizes = [1, 1280], strides = [1, 1]} : vector<2x1280xf32> to vector<1x1280xf32>
    %156 = vector.extract_strided_slice %154 {offsets = [1, 0], sizes = [1, 1280], strides = [1, 1]} : vector<2x1280xf32> to vector<1x1280xf32>
    %157 = vector.extract_strided_slice %155 {offsets = [0, 0], sizes = [1, 128], strides = [1, 1]} : vector<1x1280xf32> to vector<1x128xf32>
    %c0_58 = arith.constant 0 : index
    %c0_59 = arith.constant 0 : index
    %158 = vector.load %arg7[%c0_58, %c0_59] : memref<1x2xf32, #tpu.memory_space<vmem>>, vector<1x1xf32>
    %159 = vector.broadcast %158 : vector<1x1xf32> to vector<1x128xf32>
    %160 = arith.addf %157, %159 : vector<1x128xf32>
    %161 = vector.extract_strided_slice %155 {offsets = [0, 128], sizes = [1, 128], strides = [1, 1]} : vector<1x1280xf32> to vector<1x128xf32>
    %162 = vector.extract_strided_slice %155 {offsets = [0, 256], sizes = [1, 128], strides = [1, 1]} : vector<1x1280xf32> to vector<1x128xf32>
    %163 = vector.extract_strided_slice %155 {offsets = [0, 384], sizes = [1, 128], strides = [1, 1]} : vector<1x1280xf32> to vector<1x128xf32>
    %164 = vector.extract_strided_slice %155 {offsets = [0, 512], sizes = [1, 128], strides = [1, 1]} : vector<1x1280xf32> to vector<1x128xf32>
    %165 = vector.extract_strided_slice %155 {offsets = [0, 640], sizes = [1, 128], strides = [1, 1]} : vector<1x1280xf32> to vector<1x128xf32>
    %166 = vector.extract_strided_slice %155 {offsets = [0, 768], sizes = [1, 128], strides = [1, 1]} : vector<1x1280xf32> to vector<1x128xf32>
    %167 = vector.extract_strided_slice %155 {offsets = [0, 896], sizes = [1, 128], strides = [1, 1]} : vector<1x1280xf32> to vector<1x128xf32>
    %168 = vector.extract_strided_slice %155 {offsets = [0, 1024], sizes = [1, 128], strides = [1, 1]} : vector<1x1280xf32> to vector<1x128xf32>
    %169 = vector.extract_strided_slice %155 {offsets = [0, 1152], sizes = [1, 128], strides = [1, 1]} : vector<1x1280xf32> to vector<1x128xf32>
    %170 = vector.extract_strided_slice %156 {offsets = [0, 128], sizes = [1, 128], strides = [1, 1]} : vector<1x1280xf32> to vector<1x128xf32>
    %171 = vector.extract_strided_slice %156 {offsets = [0, 256], sizes = [1, 128], strides = [1, 1]} : vector<1x1280xf32> to vector<1x128xf32>
    %cst_60 = arith.constant 0.000000e+00 : f32
    %172 = vector.broadcast %cst_60 : f32 to vector<1x128xf32>
    %173 = arith.subf %172, %161 : vector<1x128xf32>
    %cst_61 = arith.constant 0.000000e+00 : f32
    %174 = vector.broadcast %cst_61 : f32 to vector<1x128xf32>
    %175 = arith.subf %174, %163 : vector<1x128xf32>
    %cst_62 = arith.constant 0.000000e+00 : f32
    %176 = vector.broadcast %cst_62 : f32 to vector<1x128xf32>
    %177 = arith.subf %176, %164 : vector<1x128xf32>
    %cst_63 = arith.constant 0.000000e+00 : f32
    %178 = vector.broadcast %cst_63 : f32 to vector<1x128xf32>
    %179 = arith.subf %178, %166 : vector<1x128xf32>
    %cst_64 = arith.constant 0.000000e+00 : f32
    %180 = vector.broadcast %cst_64 : f32 to vector<1x128xf32>
    %181 = arith.subf %180, %168 : vector<1x128xf32>
    %182 = arith.mulf %162, %164 : vector<1x128xf32>
    %183 = arith.mulf %173, %165 : vector<1x128xf32>
    %184 = arith.addf %182, %183 : vector<1x128xf32>
    %cst_65 = arith.constant 1.000000e+00 : f32
    %185 = vector.broadcast %cst_65 : f32 to vector<1x128xf32>
    %186 = arith.mulf %185, %184 : vector<1x128xf32>
    %187 = arith.addf %186, %170 : vector<1x128xf32>
    %188 = arith.addf %167, %169 : vector<1x128xf32>
    %cst_66 = arith.constant 0.00999999977 : f32
    %189 = vector.broadcast %cst_66 : f32 to vector<1x128xf32>
    %190 = arith.mulf %189, %188 : vector<1x128xf32>
    %191 = arith.subf %187, %190 : vector<1x128xf32>
    %192 = arith.mulf %162, %175 : vector<1x128xf32>
    %193 = arith.mulf %173, %177 : vector<1x128xf32>
    %194 = arith.addf %192, %193 : vector<1x128xf32>
    %cst_67 = arith.constant 1.000000e+00 : f32
    %195 = vector.broadcast %cst_67 : f32 to vector<1x128xf32>
    %196 = arith.mulf %195, %194 : vector<1x128xf32>
    %197 = arith.addf %196, %171 : vector<1x128xf32>
    %198 = arith.addf %179, %181 : vector<1x128xf32>
    %cst_68 = arith.constant 0.00999999977 : f32
    %199 = vector.broadcast %cst_68 : f32 to vector<1x128xf32>
    %200 = arith.mulf %199, %198 : vector<1x128xf32>
    %201 = arith.subf %197, %200 : vector<1x128xf32>
    %c0_69 = arith.constant 0 : index
    %c0_70 = arith.constant 0 : index
    %202 = vector.load %arg8[%c0_69, %c0_70] : memref<8x128xf32, #tpu.memory_space<vmem>>, vector<1x128xf32>
    tpu.vector_store %arg8[%c0_69, %c0_70], %160 {strides = array<i32>} : memref<8x128xf32, #tpu.memory_space<vmem>>, vector<1x128xf32>,
    %c1_71 = arith.constant 1 : index
    %c0_72 = arith.constant 0 : index
    %203 = vector.load %arg8[%c1_71, %c0_72] : memref<8x128xf32, #tpu.memory_space<vmem>>, vector<1x128xf32>
    tpu.vector_store %arg8[%c1_71, %c0_72], %162 {strides = array<i32>} : memref<8x128xf32, #tpu.memory_space<vmem>>, vector<1x128xf32>,
    %c2 = arith.constant 2 : index
    %c0_73 = arith.constant 0 : index
    %204 = vector.load %arg8[%c2, %c0_73] : memref<8x128xf32, #tpu.memory_space<vmem>>, vector<1x128xf32>
    tpu.vector_store %arg8[%c2, %c0_73], %173 {strides = array<i32>} : memref<8x128xf32, #tpu.memory_space<vmem>>, vector<1x128xf32>,
    %c3 = arith.constant 3 : index
    %c0_74 = arith.constant 0 : index
    %205 = vector.load %arg8[%c3, %c0_74] : memref<8x128xf32, #tpu.memory_space<vmem>>, vector<1x128xf32>
    tpu.vector_store %arg8[%c3, %c0_74], %191 {strides = array<i32>} : memref<8x128xf32, #tpu.memory_space<vmem>>, vector<1x128xf32>,
    %c4 = arith.constant 4 : index
    %c0_75 = arith.constant 0 : index
    %206 = vector.load %arg8[%c4, %c0_75] : memref<8x128xf32, #tpu.memory_space<vmem>>, vector<1x128xf32>
    tpu.vector_store %arg8[%c4, %c0_75], %201 {strides = array<i32>} : memref<8x128xf32, #tpu.memory_space<vmem>>, vector<1x128xf32>,
    %c5 = arith.constant 5 : index
    %c0_76 = arith.constant 0 : index
    %207 = vector.load %arg8[%c5, %c0_76] : memref<8x128xf32, #tpu.memory_space<vmem>>, vector<1x128xf32>
    tpu.vector_store %arg8[%c5, %c0_76], %170 {strides = array<i32>} : memref<8x128xf32, #tpu.memory_space<vmem>>, vector<1x128xf32>,
    %c6 = arith.constant 6 : index
    %c0_77 = arith.constant 0 : index
    %208 = vector.load %arg8[%c6, %c0_77] : memref<8x128xf32, #tpu.memory_space<vmem>>, vector<1x128xf32>
    tpu.vector_store %arg8[%c6, %c0_77], %171 {strides = array<i32>} : memref<8x128xf32, #tpu.memory_space<vmem>>, vector<1x128xf32>,
    %c7 = arith.constant 7 : index
    %c0_78 = arith.constant 0 : index
    %209 = vector.load %arg8[%c7, %c0_78] : memref<8x128xf32, #tpu.memory_space<vmem>>, vector<1x128xf32>
    tpu.vector_store %arg8[%c7, %c0_78], %160 {strides = array<i32>} : memref<8x128xf32, #tpu.memory_space<vmem>>, vector<1x128xf32>,
    return
  }
  func.func @transform_0(%arg0: i32) -> (i32, i32) {
    %c0_i32 = arith.constant 0 : i32
    %c0_i32_0 = arith.constant 0 : i32
    return %c0_i32, %arg0 : i32, i32
  }
  func.func @transform_1(%arg0: i32) -> (i32, i32) {
    %c0_i32 = arith.constant 0 : i32
    %c0_i32_0 = arith.constant 0 : i32
    %c0_i32_1 = arith.constant 0 : i32
    return %c0_i32, %c0_i32_0 : i32, i32
  }
  func.func @transform_2(%arg0: i32) -> (i32, i32) {
    %c0_i32 = arith.constant 0 : i32
    %c0_i32_0 = arith.constant 0 : i32
    %c0_i32_1 = arith.constant 0 : i32
    return %c0_i32, %c0_i32_0 : i32, i32
  }
  func.func @transform_3(%arg0: i32) -> (i32, i32) {
    %c0_i32 = arith.constant 0 : i32
    %c0_i32_0 = arith.constant 0 : i32
    %c0_i32_1 = arith.constant 0 : i32
    return %c0_i32, %c0_i32_0 : i32, i32
  }
  func.func @transform_4(%arg0: i32) -> (i32, i32) {
    %c0_i32 = arith.constant 0 : i32
    %c0_i32_0 = arith.constant 0 : i32
    %c0_i32_1 = arith.constant 0 : i32
    return %c0_i32, %c0_i32_0 : i32, i32
  }
  func.func @transform_5(%arg0: i32) -> (i32, i32) {
    %c0_i32 = arith.constant 0 : i32
    %c0_i32_0 = arith.constant 0 : i32
    %c0_i32_1 = arith.constant 0 : i32
    return %c0_i32, %c0_i32_0 : i32, i32
  }
  func.func @transform_6(%arg0: i32) -> (i32, i32) {
    %c0_i32 = arith.constant 0 : i32
    %c0_i32_0 = arith.constant 0 : i32
    %c0_i32_1 = arith.constant 0 : i32
    return %c0_i32, %c0_i32_0 : i32, i32
  }
  func.func @transform_7(%arg0: i32) -> (i32, i32) {
    %c0_i32 = arith.constant 0 : i32
    %c0_i32_0 = arith.constant 0 : i32
    return %c0_i32, %arg0 : i32, i32
  }
}

</mosaic_0001>

<bundles_post_ra>
// kernel: tpu_custom_call.1
= control target key start
LH: loop header
LB: loop body
LE: loop exit
PB: predicated region body
PF: predicated region fallthrough
CT: control target
= control target key end

     0   :  { %s1835_s28 = smov 127   ;;  %v1836_v4 = vmov 0   ;;  %s2600_s0 = inlined_call_operand.vmem [shape: f32[2,128], index: 0, kind: input, shape index: {}]   ;;  %s2601_s1 = inlined_call_operand.vmem [shape: f32[32,2], index: 1, kind: input, shape index: {}]   ;;  %s2602_s2 = inlined_call_operand.vmem [shape: f32[32,1], index: 2, kind: input, shape index: {}]   ;;  %s2603_s3 = inlined_call_operand.vmem [shape: f32[32,32], index: 3, kind: input, shape index: {}]   ;;  %s2604_s4 = inlined_call_operand.vmem [shape: f32[32,1], index: 4, kind: input, shape index: {}]   ;;  %s2605_s5 = inlined_call_operand.vmem [shape: f32[2,32], index: 5, kind: input, shape index: {}]   ;;  %s2606_s6 = inlined_call_operand.vmem [shape: f32[1,2], index: 6, kind: input, shape index: {}]   ;;  %s2607_s7 = inlined_call_operand.hbm [shape: f32[8,128], index: 7, kind: output, shape index: {}]  }
   0x1   :  { %v1884_v0 = vld [vmem:[%s2601_s1 + $0x10] sm:$0xff]  ;;  %v1889_v1 = vld [vmem:[%s2601_s1] sm:$0xff]  ;;  %v1896_v2 = vld [vmem:[%s2601_s1 + $0x18] sm:$0xff]  ;;  %1774 = vset.pattern.permute.xlu1 %v1836_v4  ;;  %1773 = vset.pattern.permute.xlu0 %v1836_v4 }
   0x2   :  { %45 = vrot.lane.b32.xlu1 %v1884_v0, %s1835_s28  ;;  %41 = vrot.lane.b32.xlu0 %v1889_v1, %s1835_s28  ;;  %v1901_v3 = vld [vmem:[%s2601_s1 + $0x8] sm:$0xff] }
   0x3   :  { %12 = vsyncpa [#allocation4], 0  ;;  %s1837_s10 = smov 1   ;;  %v133_v5 = vld [vmem:[%s2602_s2] sm:$0xff]  ;;  %v1838_v6 = vmov 1   ;;  %v136_v7 = vld [vmem:[%s2602_s2 + $0x18] sm:$0xff]  ;;  %v1929_v8 = vmul.f32 %v1901_v3, %v1901_v3  ;;  %v1939_v10 = vmul.f32 %v1896_v2, %v1896_v2  ;;  %v33_v13 = vmul.f32 %v1889_v1, %v1889_v1 }
   0x4   :  { %v134_v9 = vld [vmem:[%s2602_s2 + $0x8] sm:$0xff]  ;;  %v135_v11 = vld [vmem:[%s2602_s2 + $0x10] sm:$0xff]  ;;  %v35_v15 = vmul.f32 %v1884_v0, %v1884_v0  ;;  %v2608_v17 = vmov 0.0   ;;  %v1660_v41 = vld [vmem:[%s2600_s0] ss:$0 sm:$0xff]  ;;  %vm449_vm0 = vcmask 261120  }
   0x5   :  { %v58_v12 = vmul.f32 %v1929_v8, %v1901_v3  ;;  %v60_v14 = vmul.f32 %v1939_v10, %v1896_v2  ;;  %v57_v16 = vmul.f32 %v33_v13, %v1889_v1  ;;  %526 = vmatprep.mubr.f32.mxu0 %v2608_v17  ;;  %615 = vmatprep.mubr.f32.mxu1 %v2608_v17  ;;  %v1661_v42 = vld [vmem:[%s2600_s0 + $0x1] ss:$0 sm:$0xff]  ;;  %v908_v54 = vld [vmem:[%s2604_s4 + $0x8] sm:$0xff]  ;;  %v910_v61 = vld [vmem:[%s2604_s4 + $0x18] sm:$0xff] }
   0x6   :  { %47 = vrot.lane.b32.xlu1 %v1896_v2, %s1835_s28  ;;  %43 = vrot.lane.b32.xlu0 %v1901_v3, %s1835_s28  ;;  %v59_v18 = vmul.f32 %v35_v15, %v1884_v0  ;;  %v907_v53 = vld [vmem:[%s2604_s4] sm:$0xff]  ;;  %v909_v62 = vld [vmem:[%s2604_s4 + $0x10] sm:$0xff] }
   0xa   :  { %67 = vrot.lane.b32.xlu1 %v1901_v3, %s1837_s10  ;;  %65 = vrot.lane.b32.xlu0 %v1889_v1, %s1837_s10 }
   0xe   :  { %71 = vrot.lane.b32.xlu1 %v1896_v2, %s1837_s10  ;;  %69 = vrot.lane.b32.xlu0 %v1884_v0, %s1837_s10 }
  0x12   :  { %86 = vperm.xlu1 %1774, %v1901_v3   ;;  %82 = vperm.xlu0 %1773, %v1889_v1  }
  0x16   :  { %1775 = vset.pattern.permute.xlu1 %v1838_v6  ;;  %139 = vperm.xlu0 %1773, %v133_v5  }
  0x17   :  { %106 = vperm.xlu1 %1775, %v1889_v1  }
  0x1a   :  { %154 = vperm.xlu0 %1773, %v136_v7  }
  0x1b   :  { %1776 = vset.pattern.permute.xlu1 %v1836_v4 }
  0x1c   :  { %90 = vperm.xlu1 %1776, %v1884_v0  }
  0x1e   :  { %1779 = vset.pattern.permute.xlu0 %v1838_v6 }
  0x1f   :  { %110 = vperm.xlu0 %1779, %v1901_v3  }
  0x20   :  { %94 = vperm.xlu1 %1776, %v1896_v2  }
  0x23   :  { %114 = vperm.xlu0 %1779, %v1884_v0  }
  0x24   :  { %1777 = vset.pattern.permute.xlu1 %v1838_v6 }
  0x25   :  { %118 = vperm.xlu1 %1777, %v1896_v2  }
  0x27   :  { %278 = vperm.xlu0 %1779, %v1929_v8  }
  0x29   :  { %1778 = vset.pattern.permute.xlu1 %v1836_v4 }
  0x2a   :  { %144 = vperm.xlu1 %1778, %v134_v9   ;;  %v1602_v9 = vld [vmem:[%s2606_s6] sm:$0x1] }
  0x2b   :  { %286 = vperm.xlu0 %1779, %v1939_v10  }
  0x2e   :  { %149 = vperm.xlu1 %1778, %v135_v11  }
  0x2f   :  { %386 = vperm.xlu0 %1779, %v58_v12  }
  0x32   :  { %219 = vperm.xlu1 %1778, %v33_v13  }
  0x33   :  { %394 = vperm.xlu0 %1779, %v60_v14  }
  0x36   :  { %1780 = vset.pattern.permute.xlu1 %v1838_v6 }
  0x37   :  { %274 = vperm.xlu1 %1780, %v33_v13   ;;  %1785 = vset.pattern.permute.xlu0 %v1836_v4 }
  0x38   :  { %224 = vperm.xlu0 %1785, %v1929_v8  }
  0x3b   :  { %1781 = vset.pattern.permute.xlu1 %v1836_v4 }
  0x3c   :  { %234 = vperm.xlu1 %1781, %v1939_v10   ;;  %229 = vperm.xlu0 %1785, %v35_v15  }
  0x40   :  { %1782 = vset.pattern.permute.xlu1 %v1838_v6 }
  0x41   :  { %282 = vperm.xlu1 %1782, %v35_v15  }
  0x45   :  { %382 = vperm.xlu1 %1782, %v57_v16  }
  0x49   :  { %1783 = vset.pattern.permute.xlu1 %v1836_v4 }
  0x4a   :  { %299 = vperm.xlu1 %1783, %v57_v16  }
  0x4e   :  { %304 = vperm.xlu1 %1783, %v58_v12  }
  0x52   :  { %1784 = vset.pattern.permute.xlu1 %v1838_v6 }
  0x53   :  { %390 = vperm.xlu1 %1784, %v59_v18  }
  0x57   :  { %1786 = vset.pattern.permute.xlu1 %v1836_v4 }
  0x58   :  { %309 = vperm.xlu1 %1786, %v59_v18  }
  0x5c   :  { %314 = vperm.xlu1 %1786, %v60_v14  }
  0x74   :  { %v42_v19 = vpop.permute.xlu0 %41  ;;  %v46_v22 = vpop.permute.xlu1 %45 }
  0x75   :  { %v53_v20 = vmul.f32 %v42_v19, %v1889_v1  ;;  %v61_v21 = vmul.f32 %v42_v19, %v33_v13  ;;  %v55_v25 = vmul.f32 %v46_v22, %v1884_v0  ;;  %v63_v30 = vmul.f32 %v46_v22, %v35_v15 }
  0x77   :  { %327 = vperm.xlu0 %1785, %v61_v21   ;;  %247 = vperm.xlu1 %1786, %v53_v20  }
  0x78   :  { %v44_v23 = vpop.permute.xlu0 %43  ;;  %v48_v27 = vpop.permute.xlu1 %47 }
  0x79   :  { %v54_v24 = vmul.f32 %v44_v23, %v1901_v3  ;;  %v56_v29 = vmul.f32 %v48_v27, %v1896_v2  ;;  %v62_v32 = vmul.f32 %v44_v23, %v1929_v8  ;;  %v64_v37 = vmul.f32 %v48_v27, %v1939_v10 }
  0x7b   :  { %252 = vperm.xlu1 %1786, %v54_v24   ;;  %1787 = vset.pattern.permute.xlu0 %v1838_v6 }
  0x7c   :  { %v66_v26 = vpop.permute.xlu0 %65  ;;  %v68_v34 = vpop.permute.xlu1 %67 }
  0x7d   :  { %v77_v28 = vmul.f32 %v66_v26, %v33_v13  ;;  %v78_v35 = vmul.f32 %v68_v34, %v1929_v8 }
  0x7f   :  { %355 = vperm.xlu0 %1787, %v77_v28   ;;  %257 = vperm.xlu1 %1786, %v55_v25  }
  0x80   :  { %v70_v31 = vpop.permute.xlu0 %69  ;;  %v72_v36 = vpop.permute.xlu1 %71 }
  0x81   :  { %v79_v33 = vmul.f32 %v70_v31, %v35_v15  ;;  %v80_v40 = vmul.f32 %v72_v36, %v1939_v10 }
  0x83   :  { %1789 = vset.pattern.permute.xlu0 %v1836_v4  ;;  %262 = vperm.xlu1 %1786, %v56_v29  }
  0x84   :  { %337 = vperm.xlu0 %1789, %v63_v30  }
  0x87   :  { %332 = vperm.xlu1 %1786, %v62_v32  }
  0x88   :  { %1791 = vset.pattern.permute.xlu0 %v1838_v6 }
  0x89   :  { %365 = vperm.xlu0 %1791, %v79_v33  }
  0x8b   :  { %1788 = vset.pattern.permute.xlu1 %v1838_v6 }
  0x8c   :  { %360 = vperm.xlu1 %1788, %v78_v35  }
  0x8d   :  { %1793 = vset.pattern.permute.xlu0 %v1836_v4 }
  0x8e   :  { %913 = vperm.xlu0 %1793, %v907_v53  }
  0x90   :  { %1790 = vset.pattern.permute.xlu1 %v1836_v4 }
  0x91   :  { %342 = vperm.xlu1 %1790, %v64_v37   ;;  %v1980_v38 = vpop.permute.xlu1 %86  ;;  %v1982_v39 = vpop.permute.xlu0 %82 }
  0x92   :  { %v101_v43 = vmul.f32 %v1660_v41, %v1982_v39  ;;  %v102_v55 = vmul.f32 %v1660_v41, %v1980_v38  ;;  %928 = vperm.xlu0 %1793, %v910_v61  }
  0x95   :  { %1792 = vset.pattern.permute.xlu1 %v1838_v6  ;;  %v140_v44 = vpop.permute.xlu0 %139 }
  0x96   :  { %370 = vperm.xlu1 %1792, %v80_v40   ;;  %v1993_v45 = vpop.permute.xlu1 %106 }
  0x97   :  { %v125_v46 = vmul.f32 %v1661_v42, %v1993_v45 }
  0x99   :  { %v129_v47 = vadd.f32 %v125_v46, %v101_v43  ;;  %v155_v48 = vpop.permute.xlu0 %154 }
  0x9a   :  { %1794 = vset.pattern.permute.xlu1 %v1836_v4 }
  0x9b   :  { %v1997_v49 = vpop.permute.xlu1 %90  ;;  %v157_v50 = vadd.f32 %v140_v44, %v129_v47  ;;  %918 = vperm.xlu1 %1794, %v908_v54  }
  0x9c   :  { %v103_v63 = vmul.f32 %v1660_v41, %v1997_v49 }
  0x9d   :  { %1795 = vtanh.f32 %v157_v50 }
  0x9e   :  { %v1999_v51 = vpop.permute.xlu0 %110 }
  0x9f   :  { %v2001_v52 = vpop.permute.xlu1 %94  ;;  %v126_v56 = vmul.f32 %v1661_v42, %v1999_v51  ;;  %923 = vperm.xlu1 %1794, %v909_v62  }
  0xa0   :  { %v104_v58 = vmul.f32 %v1660_v41, %v2001_v52 }
  0xa1   :  { %v130_v1 = vadd.f32 %v126_v56, %v102_v55 }
  0xa2   :  { %v2011_v57 = vpop.permute.xlu0 %114 }
  0xa3   :  { %v127_v0 = vmul.f32 %v1661_v42, %v2011_v57  ;;  %1605 = vperm.xlu1 %1794, %v1602_v9  }
  0xa4   :  { %v2014_v59 = vpop.permute.xlu1 %118 }
  0xa5   :  { %v128_v60 = vmul.f32 %v1661_v42, %v2014_v59  ;;  %v131_v11 = vadd.f32 %v127_v0, %v103_v63 }
  0xa6   :  { %v279_v2 = vpop.permute.xlu0 %278 }
  0xa7   :  { %v2025_v3 = vpop.eup %1795  ;;  %v132_v4 = vadd.f32 %v128_v60, %v104_v58 }
  0xa8   :  { %v165_v5 = vmul.f32 %v2025_v3, %v2025_v3  ;;  %v173_v6 = vmul.f32 -2.0, %v2025_v3 }
  0xa9   :  { %v160_v7 = vadd.f32 %v155_v48, %v132_v4  ;;  %v145_v8 = vpop.permute.xlu1 %144 }
  0xaa   :  { %v158_v10 = vadd.f32 %v145_v8, %v130_v1  ;;  %v2033_v12 = vpop.permute.xlu0 %286  ;;  %v169_v13 = vsub.f32 1.0, %v165_v5 }
  0xab   :  { %1797 = vtanh.f32 %v160_v7 }
  0xac   :  { %1799 = vtanh.f32 %v158_v10  ;;  %v2035_v14 = vmul.f32 %v173_v6, %v169_v13  ;;  %v181_v16 = vmul.f32 %v169_v13, %v169_v13  ;;  %v201_v34 = vmul.f32 %v169_v13, %v1982_v39 }
  0xad   :  { %v150_v15 = vpop.permute.xlu1 %149  ;;  %v209_v41 = vmul.f32 %v169_v13, %v1993_v45 }
  0xae   :  { %v159_v18 = vadd.f32 %v150_v15, %v131_v11  ;;  %v387_v19 = vpop.permute.xlu0 %386  ;;  %v185_v20 = vmul.f32 %v2025_v3, %v2035_v14 }
  0xb0   :  { %1801 = vtanh.f32 %v159_v18  ;;  %v189_v21 = vadd.f32 %v185_v20, %v181_v16 }
  0xb1   :  { %v220_v22 = vpop.permute.xlu1 %219 }
  0xb2   :  { %v395_v23 = vpop.permute.xlu0 %394  ;;  %v237_v37 = vmul.f32 %v220_v22, %v2035_v14  ;;  %v2049_v53 = vmul.f32 -2.0, %v189_v21 }
  0xb5   :  { %v1798_v24 = vpop.eup %1797 }
  0xb6   :  { %v1800_v25 = vpop.eup %1799  ;;  %v168_v26 = vmul.f32 %v1798_v24, %v1798_v24  ;;  %v176_v27 = vmul.f32 -2.0, %v1798_v24  ;;  %v275_v28 = vpop.permute.xlu1 %274 }
  0xb7   :  { %v166_v29 = vmul.f32 %v1800_v25, %v1800_v25  ;;  %v174_v30 = vmul.f32 -2.0, %v1800_v25  ;;  %v225_v33 = vpop.permute.xlu0 %224  ;;  %v289_v50 = vmul.f32 %v275_v28, %v2035_v14  ;;  %v1689_v45 = vpack.c.bf16 %v1800_v25, %v2025_v3 }
  0xb8   :  { %v172_v31 = vsub.f32 1.0, %v168_v26 }
  0xb9   :  { %v170_v32 = vsub.f32 1.0, %v166_v29 }
  0xba   :  { %v1802_v35 = vpop.eup %1801  ;;  %v2040_v36 = vmul.f32 %v176_v27, %v172_v31  ;;  %v184_v40 = vmul.f32 %v172_v31, %v172_v31  ;;  %v212_v15 = vmul.f32 %v172_v31, %v2014_v59  ;;  %v2104_v27 = vld [vmem:[%s2603_s3 + $0x10] sm:$0xff] }
  0xbb   :  { %v2044_v42 = vmul.f32 %v174_v30, %v170_v32  ;;  %v182_v43 = vmul.f32 %v170_v32, %v170_v32  ;;  %v235_v44 = vpop.permute.xlu1 %234  ;;  %v202_v46 = vmul.f32 %v170_v32, %v1980_v38  ;;  %v167_v47 = vmul.f32 %v1802_v35, %v1802_v35  ;;  %v230_v1 = vpop.permute.xlu0 %229 }
  0xbc   :  { %v188_v48 = vmul.f32 %v1798_v24, %v2040_v36  ;;  %v175_v39 = vmul.f32 -2.0, %v1802_v35  ;;  %v210_v61 = vmul.f32 %v170_v32, %v1999_v51  ;;  %v204_v38 = vmul.f32 %v172_v31, %v2001_v52  ;;  %v2117_v32 = vld [vmem:[%s2603_s3 + $0x18] sm:$0xff] }
  0xbd   :  { %v186_v54 = vmul.f32 %v1800_v25, %v2044_v42  ;;  %v238_v55 = vmul.f32 %v225_v33, %v2044_v42  ;;  %v1687_v56 = vpack.c.bf16 %v202_v46, %v201_v34  ;;  %v171_v60 = vsub.f32 1.0, %v167_v47  ;;  %v2093_v25 = vld [vmem:[%s2603_s3 + $0x8] sm:$0xff] }
  0xbe   :  { %v192_v58 = vadd.f32 %v188_v48, %v184_v40  ;;  %v290_v62 = vmul.f32 %v279_v2, %v2044_v42  ;;  %v240_v0 = vmul.f32 %v235_v44, %v2040_v36  ;;  %v1697_v3 = vpack.c.bf16 %v210_v61, %v209_v41 }
  0xbf   :  { %v190_v63 = vadd.f32 %v186_v54, %v182_v43  ;;  %1688 = vmatprep.subr.bf16.mxu0 %v1687_v56  ;;  %v1695_v4 = vpack.c.bf16 %v238_v55, %v237_v37  ;;  %v2060_v6 = vmul.f32 %v175_v39, %v171_v60  ;;  %v203_v51 = vmul.f32 %v171_v60, %v1997_v49 }
  0xc0   :  { %v2058_v5 = vmul.f32 -2.0, %v192_v58  ;;  %v2062_v7 = vpop.permute.xlu1 %282  ;;  %1690 = vmatpush1.bf16.msra.mxu0 %v1689_v45  ;;  %v1693_v52 = vpack.c.bf16 %v1798_v24, %v1802_v35  ;;  %v211_v2 = vmul.f32 %v171_v60, %v2011_v57  ;;  %v183_v9 = vmul.f32 %v171_v60, %v171_v60 }
  0xc1   :  { %v2065_v8 = vmul.f32 -2.0, %v190_v63  ;;  %1696 = vmatprep.subr.bf16.mxu1 %v1695_v4  ;;  %v239_v11 = vmul.f32 %v230_v1, %v2060_v6  ;;  %v1691_v13 = vpack.c.bf16 %v204_v38, %v203_v51  ;;  %v187_v49 = vmul.f32 %v1802_v35, %v2060_v6 }
  0xc2   :  { %v2069_v10 = vmul.f32 %v395_v23, %v2058_v5  ;;  %1698 = vmatpush1.bf16.msra.mxu1 %v1697_v3  ;;  %v1703_v18 = vpack.c.bf16 %v290_v62, %v289_v50  ;;  %v1701_v22 = vpack.c.bf16 %v212_v15, %v211_v2  ;;  %v2083_v23 = vld [vmem:[%s2603_s3] sm:$0xff]  ;;  %v292_v47 = vmul.f32 %v2033_v12, %v2040_v36 }
  0xc3   :  { %v2074_v16 = vmul.f32 %v387_v19, %v2065_v8  ;;  %v1699_v20 = vpack.c.bf16 %v240_v0, %v239_v11  ;;  %1692 = vmatprep.subr.bf16.mxu0 %v1691_v13  ;;  %v191_v59 = vadd.f32 %v187_v49, %v183_v9  ;;  %v291_v48 = vmul.f32 %v2062_v7, %v2060_v6 }
  0xc4   :  { %v383_v21 = vpop.permute.xlu1 %382  ;;  %1694 = vmatpush1.bf16.msra.mxu0 %v1693_v52 }
  0xc5   :  { %v2078_v57 = vmul.f32 %v383_v21, %v2049_v53  ;;  %1700 = vmatprep.subr.bf16.mxu1 %v1699_v20  ;;  %1704 = vmatprep.subr.bf16.mxu0 %v1703_v18  ;;  %v195_v31 = vmul.f32 -2.0, %v191_v59  ;;  %v1707_v56 = vpack.c.bf16 %v292_v47, %v291_v48 }
  0xc6   :  { %1702 = vmatpush1.bf16.msra.mxu1 %v1701_v22 }
  0xc7   :  { %v1719_v19 = vpack.c.bf16 %v2074_v16, %v2078_v57  ;;  %1662 = vmatmul.mubr.msk.f32.vlgmr.msra.gmra.mrb[0].mxu0 %vm449_vm0, %v2083_v23 }
  0xc8   :  { %532 = vmatprep.mubr.f32.mxu0 %v2608_v17 }
  0xc9   :  { %v300_v24 = vpop.permute.xlu1 %299  ;;  %1666 = vmatmul.mubr.msk.f32.vlgmr.msra.gmra.mrb[0].mxu1 %vm449_vm0, %v2083_v23 }
  0xca   :  { %621 = vmatprep.mubr.f32.mxu1 %v2608_v17  ;;  %v317_v28 = vmul.f32 %v300_v24, %v2049_v53 }
  0xcb   :  { %1663 = vmatmul.mubr.msk.f32.gmra.mrb[2].mxu0 %vm449_vm0, %v2093_v25 }
  0xcc   :  { %538 = vmatprep.mubr.f32.mxu0 %v2608_v17 }
  0xcd   :  { %v305_v26 = vpop.permute.xlu1 %304  ;;  %1667 = vmatmul.mubr.msk.f32.gmra.mrb[2].mxu1 %vm449_vm0, %v2093_v25 }
  0xce   :  { %v318_v29 = vmul.f32 %v305_v26, %v2065_v8  ;;  %627 = vmatprep.mubr.f32.mxu1 %v2608_v17 }
  0xcf   :  { %1664 = vmatmul.mubr.msk.f32.gmra.mrb[4].mxu0 %vm449_vm0, %v2104_v27 }
  0xd0   :  { %v1713_v30 = vpack.c.bf16 %v318_v29, %v317_v28  ;;  %544 = vmatprep.mubr.f32.mxu0 %v2608_v17 }
  0xd1   :  { %1668 = vmatmul.mubr.msk.f32.gmra.mrb[4].mxu1 %vm449_vm0, %v2104_v27 }
  0xd2   :  { %v391_v33 = vpop.permute.xlu1 %390  ;;  %633 = vmatprep.mubr.f32.mxu1 %v2608_v17 }
  0xd3   :  { %v399_v34 = vmul.f32 %v391_v33, %v195_v31  ;;  %1665 = vmatmul.mubr.msk.f32.gmra.mrb[6].mxu0 %vm449_vm0, %v2117_v32 }
  0xd4   :  { %704 = vmatprep.mubr.f32.mxu0 %v2608_v17 }
  0xd5   :  { %v1723_v35 = vpack.c.bf16 %v2069_v10, %v399_v34  ;;  %1669 = vmatmul.mubr.msk.f32.gmra.mrb[6].mxu1 %vm449_vm0, %v2117_v32 }
  0xd6   :  { %793 = vmatprep.mubr.f32.mxu1 %v2608_v17 }
  0xd7   :  { %v310_v37 = vpop.permute.xlu1 %309 }
  0xd8   :  { %v319_v41 = vmul.f32 %v310_v37, %v195_v31 }
  0xdb   :  { %v315_v40 = vpop.permute.xlu1 %314 }
  0xdc   :  { %v320_v43 = vmul.f32 %v315_v40, %v2058_v5 }
  0xde   :  { %v1717_v44 = vpack.c.bf16 %v320_v43, %v319_v41 }
  0xf6   :  { %v248_v46 = vpop.permute.xlu1 %247  ;;  %v328_v60 = vpop.permute.xlu0 %327 }
  0xf7   :  { %v265_v39 = vmul.f32 %v248_v46, %v2035_v14  ;;  %v345_v63 = vmul.f32 %v328_v60, %v2049_v53 }
  0xfa   :  { %v253_v50 = vpop.permute.xlu1 %252 }
  0xfb   :  { %v266_v54 = vmul.f32 %v253_v50, %v2044_v42 }
  0xfd   :  { %v1705_v55 = vpack.c.bf16 %v266_v54, %v265_v39 }
  0xfe   :  { %v258_v45 = vpop.permute.xlu1 %257  ;;  %v356_v0 = vpop.permute.xlu0 %355 }
  0xff   :  { %1706 = vmatpush1.bf16.msra.mxu0 %v1705_v55  ;;  %v267_v61 = vmul.f32 %v258_v45, %v2060_v6  ;;  %v373_v4 = vmul.f32 %v356_v0, %v2049_v53 }
 0x100   :  { %1708 = vmatprep.subr.bf16.mxu0 %v1707_v56 }
 0x102   :  { %v263_v58 = vpop.permute.xlu1 %262 }
 0x103   :  { %v268_v38 = vmul.f32 %v263_v58, %v2040_v36  ;;  %v338_v6 = vpop.permute.xlu0 %337 }
 0x104   :  { %v347_v51 = vmul.f32 %v338_v6, %v195_v31 }
 0x105   :  { %v1709_v12 = vpack.c.bf16 %v268_v38, %v267_v61 }
 0x106   :  { %v333_v62 = vpop.permute.xlu1 %332 }
 0x107   :  { %v346_v14 = vmul.f32 %v333_v62, %v2065_v8  ;;  %1710 = vmatpush1.bf16.msra.mxu0 %v1709_v12 }
 0x108   :  { %1720 = vmatprep.subr.bf16.mxu0 %v1719_v19  ;;  %v366_v53 = vpop.permute.xlu0 %365 }
 0x109   :  { %v1711_v42 = vpack.c.bf16 %v346_v14, %v345_v63  ;;  %v375_v9 = vmul.f32 %v366_v53, %v195_v31 }
 0x10a   :  { %1670 = vmatmul.mubr.msk.f32.vlgmr.msra.gmra.mrb[8].mxu0 %vm449_vm0, %v2083_v23 }
 0x10b   :  { %v361_v1 = vpop.permute.xlu1 %360  ;;  %1712 = vmatprep.subr.bf16.mxu1 %v1711_v42  ;;  %710 = vmatprep.mubr.f32.mxu0 %v2608_v17 }
 0x10c   :  { %v374_v36 = vmul.f32 %v361_v1, %v2065_v8  ;;  %1714 = vmatpush1.bf16.msra.mxu1 %v1713_v30 }
 0x10e   :  { %v1721_v7 = vpack.c.bf16 %v374_v36, %v373_v4  ;;  %1671 = vmatmul.mubr.msk.f32.gmra.mrb[10].mxu0 %vm449_vm0, %v2093_v25 }
 0x10f   :  { %716 = vmatprep.mubr.f32.mxu0 %v2608_v17 }
 0x110   :  { %v343_v3 = vpop.permute.xlu1 %342  ;;  %1722 = vmatpush1.bf16.msra.mxu0 %v1721_v7 }
 0x111   :  { %v348_v52 = vmul.f32 %v343_v3, %v2058_v5  ;;  %1724 = vmatprep.subr.bf16.mxu0 %v1723_v35 }
 0x112   :  { %1672 = vmatmul.mubr.msk.f32.gmra.mrb[12].mxu0 %vm449_vm0, %v2104_v27 }
 0x113   :  { %v1715_v2 = vpack.c.bf16 %v348_v52, %v347_v51  ;;  %722 = vmatprep.mubr.f32.mxu0 %v2608_v17 }
 0x115   :  { %v371_v8 = vpop.permute.xlu1 %370  ;;  %1716 = vmatprep.subr.bf16.mxu1 %v1715_v2 }
 0x116   :  { %v376_v10 = vmul.f32 %v371_v8, %v2058_v5  ;;  %1673 = vmatmul.mubr.msk.f32.gmra.mrb[14].mxu0 %vm449_vm0, %v2117_v32  ;;  %1718 = vmatpush1.bf16.msra.mxu1 %v1717_v44  ;;  %v914_v5 = vpop.permute.xlu0 %913 }
 0x117   :  { %882 = vmatprep.mubr.f32.mxu0 %v2608_v17 }
 0x118   :  { %v1725_v11 = vpack.c.bf16 %v376_v10, %v375_v9 }
 0x119   :  { %1674 = vmatmul.mubr.msk.f32.vlgmr.msra.gmra.mrb[8].mxu1 %vm449_vm0, %v2083_v23 }
 0x11a   :  { %1726 = vmatpush1.bf16.msra.mxu0 %v1725_v11  ;;  %799 = vmatprep.mubr.f32.mxu1 %v2608_v17  ;;  %v919_v15 = vpop.permute.xlu1 %918  ;;  %v929_v41 = vpop.permute.xlu0 %928 }
 0x11d   :  { %1675 = vmatmul.mubr.msk.f32.gmra.mrb[10].mxu1 %vm449_vm0, %v2093_v25  ;;  %1678 = vmatmul.mubr.msk.f32.vlgmr.msra.gmra.mrb[16].mxu0 %vm449_vm0, %v2083_v23 }
 0x11e   :  { %805 = vmatprep.mubr.f32.mxu1 %v2608_v17  ;;  %888 = vmatprep.mubr.f32.mxu0 %v2608_v17 }
 0x121   :  { %1676 = vmatmul.mubr.msk.f32.gmra.mrb[12].mxu1 %vm449_vm0, %v2104_v27  ;;  %1679 = vmatmul.mubr.msk.f32.gmra.mrb[18].mxu0 %vm449_vm0, %v2093_v25 }
 0x122   :  { %811 = vmatprep.mubr.f32.mxu1 %v2608_v17  ;;  %894 = vmatprep.mubr.f32.mxu0 %v2608_v17 }
 0x125   :  { %1677 = vmatmul.mubr.msk.f32.gmra.mrb[14].mxu1 %vm449_vm0, %v2117_v32  ;;  %1680 = vmatmul.mubr.msk.f32.gmra.mrb[20].mxu0 %vm449_vm0, %v2104_v27  ;;  %v924_v27 = vpop.permute.xlu1 %923 }
 0x126   :  { %900 = vmatprep.mubr.f32.mxu0 %v2608_v17  ;;  %1311 = vmatprep.mubr.f32.mxu1 %v2608_v17 }
 0x129   :  { %1681 = vmatmul.mubr.msk.f32.gmra.mrb[22].mxu0 %vm449_vm0, %v2117_v32 }
 0x12a   :  { %1453 = vmatprep.mubr.f32.mxu0 %v2608_v17 }
 0x19a   :  { %v528_v13 = vpop.f32.mrb[0].mxu0 }
 0x19b   :  { %v2180_v16 = vpop.f32.mrb[1].mxu0  ;;  %v931_v49 = vadd.f32 %v914_v5, %v528_v13 }
 0x19c   :  { %v2184_v18 = vmul.f32 %v2180_v16, %v2180_v16  ;;  %v2186_v20 = vpop.f32.mrb[0].mxu1 }
 0x19d   :  { %1803 = vtanh.f32 %v931_v49  ;;  %v2190_v21 = vmul.f32 %v2186_v20, %v2186_v20  ;;  %v2192_v57 = vpop.f32.mrb[1].mxu1  ;;  %v979_v22 = vmul.f32 %v2186_v20, %v2180_v16 }
 0x19e   :  { %v534_v23 = vpop.f32.mrb[2].mxu0  ;;  %v2198_v59 = vmul.f32 %v2184_v18, %v2186_v20 }
 0x19f   :  { %v932_v19 = vadd.f32 %v919_v15, %v534_v23  ;;  %v2200_v24 = vpop.f32.mrb[3].mxu0  ;;  %v2204_v25 = vmul.f32 %v2190_v21, %v2180_v16 }
 0x1a0   :  { %v2208_v26 = vmul.f32 %v2200_v24, %v2200_v24  ;;  %v2210_v28 = vpop.f32.mrb[2].mxu1 }
 0x1a1   :  { %1805 = vtanh.f32 %v932_v19  ;;  %v2214_v29 = vmul.f32 %v2210_v28, %v2210_v28  ;;  %v2216_v30 = vpop.f32.mrb[3].mxu1  ;;  %v2220_v31 = vmul.f32 %v2210_v28, %v2200_v24 }
 0x1a2   :  { %v540_v32 = vpop.f32.mrb[4].mxu0  ;;  %v2224_v33 = vmul.f32 %v2208_v26, %v2210_v28 }
 0x1a3   :  { %v2226_v34 = vpop.f32.mrb[5].mxu0  ;;  %v933_v35 = vadd.f32 %v924_v27, %v540_v32  ;;  %v2230_v37 = vmul.f32 %v2214_v29, %v2200_v24 }
 0x1a4   :  { %v2234_v40 = vmul.f32 %v2226_v34, %v2226_v34  ;;  %v2236_v43 = vpop.f32.mrb[4].mxu1 }
 0x1a5   :  { %1807 = vtanh.f32 %v933_v35  ;;  %v2240_v44 = vmul.f32 %v2236_v43, %v2236_v43  ;;  %v2242_v46 = vpop.f32.mrb[5].mxu1  ;;  %v2246_v47 = vmul.f32 %v2236_v43, %v2226_v34 }
 0x1a6   :  { %v546_v48 = vpop.f32.mrb[6].mxu0  ;;  %v2250_v50 = vmul.f32 %v2234_v40, %v2236_v43 }
 0x1a7   :  { %v1804_v39 = vpop.eup %1803  ;;  %v934_v54 = vadd.f32 %v929_v41, %v546_v48  ;;  %v2252_v55 = vpop.f32.mrb[7].mxu0  ;;  %v2256_v56 = vmul.f32 %v2240_v44, %v2226_v34 }
 0x1a8   :  { %v939_v45 = vmul.f32 %v1804_v39, %v1804_v39  ;;  %v2260_v58 = vmul.f32 %v2252_v55, %v2252_v55  ;;  %v947_v60 = vmul.f32 -2.0, %v1804_v39  ;;  %v2262_v61 = vpop.f32.mrb[6].mxu1 }
 0x1a9   :  { %1809 = vtanh.f32 %v934_v54  ;;  %v2266_v38 = vmul.f32 %v2262_v61, %v2262_v61  ;;  %v2268_v12 = vpop.f32.mrb[7].mxu1  ;;  %v2272_v62 = vmul.f32 %v2262_v61, %v2252_v55 }
 0x1aa   :  { %v2274_v63 = vsub.f32 1.0, %v939_v45  ;;  %v2278_v0 = vmul.f32 %v2260_v58, %v2262_v61 }
 0x1ab   :  { %v2280_v14 = vpop.eup %1805  ;;  %v2284_v42 = vmul.f32 %v2266_v38, %v2252_v55 }
 0x1ac   :  { %v940_v1 = vmul.f32 %v2280_v14, %v2280_v14  ;;  %v1729_v4 = vpack.c.bf16 %v2280_v14, %v1804_v39  ;;  %v951_v36 = vmul.f32 %v947_v60, %v2274_v63  ;;  %v995_v6 = vmul.f32 %v2274_v63, %v2180_v16 }
 0x1ad   :  { %v1015_v7 = vmul.f32 %v2274_v63, %v2192_v57  ;;  %v948_v3 = vmul.f32 -2.0, %v2280_v14  ;;  %v955_v9 = vmul.f32 %v2274_v63, %v2274_v63 }
 0x1ae   :  { %v2295_v51 = vsub.f32 1.0, %v940_v1  ;;  %v2298_v52 = vmul.f32 %v951_v36, %v2180_v16  ;;  %v2301_v53 = vmul.f32 %v951_v36, %v2186_v20  ;;  %v1011_v2 = vmul.f32 %v2184_v18, %v951_v36 }
 0x1af   :  { %v2304_v8 = vpop.eup %1807  ;;  %v959_v10 = vmul.f32 %v1804_v39, %v951_v36  ;;  %v2308_v11 = vmul.f32 %v979_v22, %v951_v36  ;;  %v2311_v5 = vmul.f32 %v2190_v21, %v951_v36 }
 0x1b0   :  { %v941_v13 = vmul.f32 %v2304_v8, %v2304_v8  ;;  %v996_v15 = vmul.f32 %v2295_v51, %v2200_v24  ;;  %v1019_v49 = vadd.f32 %v1015_v7, %v1011_v2  ;;  %v1067_v23 = vmul.f32 3.0, %v2298_v52 }
 0x1b1   :  { %2612 = vst [vmem:[#allocation6_spill] sm:$0xff] %v2311_v5  ;;  %v2320_v19 = vmul.f32 %v2301_v53, %v2192_v57  ;;  %v952_v27 = vmul.f32 %v948_v3, %v2295_v51  ;;  %v1016_v22 = vmul.f32 %v2295_v51, %v2216_v30  ;;  %v949_v32 = vmul.f32 -2.0, %v2304_v8 }
 0x1b2   :  { %v2326_v35 = vsub.f32 1.0, %v941_v13  ;;  %v1727_v41 = vpack.c.bf16 %v996_v15, %v995_v6  ;;  %v2329_v48 = vmul.f32 %v1067_v23, %v2192_v57  ;;  %v963_v1 = vadd.f32 %v959_v10, %v955_v9 }
 0x1b3   :  { %2613 = vst [vmem:[#allocation7_spill] sm:$0xff] %v2320_v19  ;;  %v2331_v39 = vpop.eup %1809  ;;  %v2334_v54 = vmul.f32 %v952_v27, %v2200_v24  ;;  %v2337_v45 = vmul.f32 %v952_v27, %v2210_v28  ;;  %v1012_v60 = vmul.f32 %v2208_v26, %v952_v27 }
 0x1b4   :  { %v942_v36 = vmul.f32 %v2331_v39, %v2331_v39  ;;  %1728 = vmatprep.subr.bf16.mxu1 %v1727_v41  ;;  %v997_v6 = vmul.f32 %v2326_v35, %v2226_v34  ;;  %v1733_v57 = vpack.c.bf16 %v2331_v39, %v2304_v8  ;;  %v953_v7 = vmul.f32 %v949_v32, %v2326_v35 }
 0x1b5   :  { %1730 = vmatpush1.bf16.msra.mxu1 %v1729_v4  ;;  %v1020_v3 = vadd.f32 %v1016_v22, %v1012_v60  ;;  %v1068_v2 = vmul.f32 3.0, %v2334_v54  ;;  %v2350_v13 = vmul.f32 %v2337_v45, %v2216_v30  ;;  %v1017_v9 = vmul.f32 %v2326_v35, %v2242_v46 }
 0x1b6   :  { %v2354_v10 = vsub.f32 1.0, %v942_v36  ;;  %v2357_v15 = vmul.f32 %v953_v7, %v2226_v34  ;;  %v2360_v23 = vmul.f32 %v953_v7, %v2236_v43  ;;  %v1013_v4 = vmul.f32 %v2234_v40, %v953_v7 }
 0x1b7   :  { %2614 = vst [vmem:[#allocation8_spill] sm:$0xff] %v2350_v13  ;;  %v2364_v22 = vmul.f32 %v1068_v2, %v2216_v30  ;;  %v1735_v32 = vpack.c.bf16 %v1020_v3, %v1019_v49  ;;  %v950_v41 = vmul.f32 -2.0, %v2331_v39  ;;  %v2367_v60 = vmul.f32 -2.0, %v963_v1 }
 0x1b8   :  { %v998_v36 = vmul.f32 %v2354_v10, %v2252_v55  ;;  %v1021_v17 = vadd.f32 %v1017_v9, %v1013_v4  ;;  %v1069_v13 = vmul.f32 3.0, %v2357_v15  ;;  %v2374_v19 = vmul.f32 %v2360_v23, %v2242_v46 }
 0x1b9   :  { %v954_v5 = vmul.f32 %v950_v41, %v2354_v10  ;;  %v1018_v30 = vmul.f32 %v2354_v10, %v2268_v12  ;;  %v2381_v49 = vmul.f32 %v2198_v59, %v2367_v60  ;;  %v2385_v1 = vmul.f32 %v2204_v25, %v2367_v60 }
 0x1ba   :  { %2615 = vst [vmem:[#allocation9_spill] sm:$0xff] %v2374_v19  ;;  %v1731_v3 = vpack.c.bf16 %v998_v36, %v997_v6  ;;  %v2388_v2 = vmul.f32 %v1069_v13, %v2242_v46  ;;  %v956_v59 = vmul.f32 %v2295_v51, %v2295_v51  ;;  %v960_v19 = vmul.f32 %v2280_v14, %v952_v27  ;;  %v2410_v13 = vld [vmem:[%s2605_s5] sm:$0x3]  ;;  %s1840_s5 = smov [#allocation3]  }
 0x1bb   :  { %v2391_v9 = vmul.f32 %v954_v5, %v2252_v55  ;;  %v2394_v4 = vmul.f32 %v954_v5, %v2262_v61  ;;  %v1014_v41 = vmul.f32 %v2260_v58, %v954_v5  ;;  %v2401_v25 = vmul.f32 %v2220_v31, %v952_v27  ;;  %s1652_s13 = sshll.u32 %s1840_s5, 4  ;;  %s1653_s13 = int_to_ptr.vmem [resolvable:$true] %s1652_s13 }
 0x1bc   :  { %1732 = vmatprep.subr.bf16.mxu1 %v1731_v3  ;;  %v1003_v46 = vmul.f32 %v2274_v63, %v2186_v20  ;;  %v1059_v6 = vmul.f32 %v2184_v18, %v2180_v16  ;;  %v2418_v31 = vmul.f32 %v2214_v29, %v952_v27  ;;  %v1004_v16 = vmul.f32 %v2295_v51, %v2210_v28  ;;  %s1811_s14 = scalar_lea.vmem %s1653_s13, 128  ;;  %p1816_p1 = scmp.lt.s32.totalorder %s1653_s13, %s1653_s13 }
 0x1bd   :  { %2616 = vst [vmem:[#allocation10_spill] sm:$0xff] %v2394_v4  ;;  %2617 = vst [vmem:[#allocation11_spill] sm:$0xff] %v2401_v25  ;;  %1734 = vmatpush1.bf16.msra.mxu1 %v1733_v57  ;;  %v1022_v36 = vadd.f32 %v1018_v30, %v1014_v41  ;;  %v1070_v3 = vmul.f32 3.0, %v2391_v9  ;;  %v2415_v14 = vmul.f32 %v2394_v4, %v2268_v12  ;;  %p1812_p0 = scmp.ne.s32.totalorder %s1653_s13, %s1811_s14  ;;  %p1817_p2 = scmp.lt.s32.totalorder %s1811_s14, %s1811_s14 }
 0x1be   :  { %1736 = vmatprep.subr.bf16.mxu1 %v1735_v32  ;;  %v964_v25 = vadd.f32 %v960_v19, %v956_v59  ;;  %v957_v18 = vmul.f32 %v2326_v35, %v2326_v35  ;;  %v1171_v57 = vmul.f32 %v2190_v21, %v2186_v20  ;;  %v961_v4 = vmul.f32 %v2304_v8, %v953_v7 }
 0x1bf   :  { %2618 = vst [vmem:[#allocation12_spill] sm:$0xff] %v2415_v14  ;;  %v1074_v30 = vmul.f32 %v1070_v3, %v2268_v12  ;;  %v1739_v41 = vpack.c.bf16 %v1022_v36, %v1021_v17  ;;  %v2429_v14 = vmul.f32 %v2246_v47, %v953_v7  ;;  %v1737_v27 = vpack.c.bf16 %v1004_v16, %v1003_v46  ;;  %p1818_p3 = por %p1817_p2, %p1816_p1 }
 0x1c0   :  { %1682 = vmatmul.mubr.msk.f32.vlgmr.msra.gmra.mrb[16].mxu1 %vm449_vm0, %v2410_v13  ;;  %v968_v19 = vmul.f32 -2.0, %v964_v25  ;;  %v1060_v32 = vmul.f32 %v2208_v26, %v2200_v24  ;;  %v1172_v59 = vmul.f32 %v2214_v29, %v2210_v28  ;;  %v965_v20 = vadd.f32 %v961_v4, %v957_v18 }
 0x1c1   :  { %v2438_v21 = vmul.f32 %v2240_v44, %v953_v7  ;;  %v958_v17 = vmul.f32 %v2354_v10, %v2354_v10  ;;  %v1061_v47 = vmul.f32 %v2234_v40, %v2226_v34  ;;  %v2619_v12 = vmov 0.0   ;;  %1738 = vmatpush1.bf16.msra.mxu1 %v1737_v27  ;;  %p1819_p4 = pnand %p1818_p3, %p1812_p0 }
 0x1c2   :  { %1382 = vmatprep.mubr.f32.mxu1 %v2619_v12  ;;  %v2446_v8 = vmul.f32 %v2224_v33, %v968_v19  ;;  %v2449_v24 = vmul.f32 %v2230_v37, %v968_v19  ;;  %v962_v26 = vmul.f32 %v2331_v39, %v954_v5  ;;  %v2453_v28 = vmul.f32 %v2272_v62, %v954_v5 }
 0x1c3   :  { %1740 = vmatprep.subr.bf16.mxu1 %v1739_v41  ;;  %v969_v29 = vmul.f32 -2.0, %v965_v20  ;;  %v2456_v7 = vmul.f32 %v2266_v38, %v954_v5  ;;  %v1062_v34 = vmul.f32 %v2260_v58, %v2252_v55  ;;  %v1173_v33 = vmul.f32 %v2240_v44, %v2236_v43 }
 0x1c4   :  { %v966_v40 = vadd.f32 %v962_v26, %v958_v17  ;;  %v1063_v37 = vmul.f32 %v1059_v6, %v2367_v60  ;;  %v1005_v39 = vmul.f32 %v2326_v35, %v2236_v43  ;;  %v1174_v62 = vmul.f32 %v2266_v38, %v2262_v61 }
 0x1c5   :  { %v2468_v4 = vmul.f32 %v2250_v50, %v969_v29  ;;  %v2471_v5 = vmul.f32 %v2256_v56, %v969_v29  ;;  %v1006_v55 = vmul.f32 %v2354_v10, %v2262_v61  ;;  %v1064_v58 = vmul.f32 %v1060_v32, %v968_v19 }
 0x1c6   :  { %v970_v44 = vmul.f32 -2.0, %v966_v40  ;;  %v2476_v25 = vadd.f32 %v2329_v48, %v1063_v37  ;;  %v1175_v46 = vmul.f32 %v1171_v57, %v2367_v60  ;;  %v1065_v43 = vmul.f32 %v1061_v47, %v969_v29 }
 0x1c7   :  { %v1741_v6 = vpack.c.bf16 %v1006_v55, %v1005_v39  ;;  %v2480_v38 = vadd.f32 %v2364_v22, %v1064_v58  ;;  %v1176_v50 = vmul.f32 %v1172_v59, %v968_v19  ;;  %v2482_v36 = vmul.f32 %v1173_v33, %v969_v29  ;;  %v2621_v58 = vld [vmem:[#allocation7_spill] sm:$0xff] }
 0x1c8   :  { %v2485_v56 = vmul.f32 %v2278_v0, %v970_v44  ;;  %v2488_v61 = vmul.f32 %v2284_v42, %v970_v44  ;;  %v2491_v3 = vadd.f32 %v2388_v2, %v1065_v43  ;;  %v1066_v48 = vmul.f32 %v1062_v34, %v970_v44  ;;  %v2620_v34 = vld [vmem:[#allocation6_spill] sm:$0xff] }
 0x1c9   :  { %1742 = vmatpush1.bf16.msra.mxu1 %v1741_v6  ;;  %v2493_v60 = vmul.f32 %v1174_v62, %v970_v44  ;;  %v1139_v0 = vmul.f32 2.0, %v2301_v53  ;;  %v1179_v22 = vmul.f32 3.0, %v2301_v53  ;;  %v1099_v42 = vmul.f32 2.0, %v2298_v52 }
 0x1ca   :  { %v2495_v16 = vadd.f32 %v1074_v30, %v1066_v48  ;;  %v1100_v2 = vmul.f32 2.0, %v2334_v54  ;;  %v1140_v27 = vmul.f32 2.0, %v2337_v45  ;;  %v1180_v17 = vmul.f32 3.0, %v2337_v45  ;;  %v2622_v48 = vld [vmem:[#allocation11_spill] sm:$0xff] }
 0x1cb   :  { %v1101_v29 = vmul.f32 2.0, %v2357_v15  ;;  %v1141_v37 = vmul.f32 2.0, %v2360_v23  ;;  %v1181_v39 = vmul.f32 3.0, %v2360_v23 }
 0x1cc   :  { %1683 = vmatmul.mubr.msk.f32.vlgmr.msra.gmra.mrb[18].mxu1 %vm449_vm0, %v2410_v13 }
 0x1cd   :  { %1524 = vmatprep.mubr.f32.mxu1 %v2619_v12 }
 0x1dd   :  { %v706_v18 = vpop.f32.mrb[8].mxu0 }
 0x1de   :  { %v1031_v57 = vmul.f32 %v2274_v63, %v706_v18  ;;  %v1103_v41 = vmul.f32 %v1099_v42, %v706_v18  ;;  %v1143_v19 = vmul.f32 %v1139_v0, %v706_v18  ;;  %v708_v30 = vpop.f32.mrb[9].mxu0 }
 0x1df   :  { %v1047_v32 = vmul.f32 %v2274_v63, %v708_v30  ;;  %v1151_v59 = vmul.f32 %v2298_v52, %v708_v30  ;;  %v1183_v20 = vmul.f32 %v1179_v22, %v708_v30  ;;  %v1102_v22 = vmul.f32 2.0, %v2391_v9 }
 0x1e0   :  { %v1035_v53 = vadd.f32 %v1031_v57, %v2308_v11  ;;  %v1107_v47 = vadd.f32 %v1103_v41, %v2381_v49  ;;  %v1147_v26 = vadd.f32 %v1143_v19, %v2385_v1 }
 0x1e1   :  { %v1051_v33 = vadd.f32 %v1047_v32, %v2620_v34  ;;  %v712_v40 = vpop.f32.mrb[10].mxu0  ;;  %v2516_v62 = vadd.f32 %v1183_v20, %v1175_v46 }
 0x1e2   :  { %v1032_v52 = vmul.f32 %v2295_v51, %v712_v40  ;;  %v1104_v45 = vmul.f32 %v1100_v2, %v712_v40  ;;  %v1144_v55 = vmul.f32 %v1140_v27, %v712_v40  ;;  %v714_v11 = vpop.f32.mrb[11].mxu0  ;;  %v1115_v49 = vadd.f32 %v2621_v58, %v1107_v47  ;;  %v2623_v2 = vld [vmem:[#allocation10_spill] sm:$0xff] }
 0x1e3   :  { %v1048_v1 = vmul.f32 %v2295_v51, %v714_v11  ;;  %v1152_v44 = vmul.f32 %v2334_v54, %v714_v11  ;;  %v1184_v43 = vmul.f32 %v1180_v17, %v714_v11  ;;  %v2522_v6 = vadd.f32 %v1151_v59, %v1147_v26 }
 0x1e4   :  { %v1036_v0 = vadd.f32 %v1032_v52, %v2622_v48  ;;  %v1108_v23 = vadd.f32 %v1104_v45, %v2446_v8  ;;  %v1148_v46 = vadd.f32 %v1144_v55, %v2449_v24  ;;  %v1142_v57 = vmul.f32 2.0, %v2623_v2 }
 0x1e5   :  { %v1052_v42 = vadd.f32 %v1048_v1, %v2418_v31  ;;  %v718_v18 = vpop.f32.mrb[12].mxu0  ;;  %v1182_v41 = vmul.f32 3.0, %v2623_v2  ;;  %v2531_v19 = vadd.f32 %v1184_v43, %v1176_v50  ;;  %v2624_v50 = vld [vmem:[#allocation8_spill] sm:$0xff] }
 0x1e6   :  { %v1033_v54 = vmul.f32 %v2326_v35, %v718_v18  ;;  %v1105_v30 = vmul.f32 %v1101_v29, %v718_v18  ;;  %v1145_v27 = vmul.f32 %v1141_v37, %v718_v18  ;;  %v720_v32 = vpop.f32.mrb[13].mxu0  ;;  %v1745_v59 = vpack.c.bf16 %v1036_v0, %v1035_v53 }
 0x1e7   :  { %v1049_v8 = vmul.f32 %v2326_v35, %v720_v32  ;;  %v1153_v24 = vmul.f32 %v2357_v15, %v720_v32  ;;  %v1185_v20 = vmul.f32 %v1181_v39, %v720_v32  ;;  %v1743_v17 = vpack.c.bf16 %v1052_v42, %v1051_v33 }
 0x1e8   :  { %v1037_v31 = vadd.f32 %v1033_v54, %v2429_v14  ;;  %v1109_v47 = vadd.f32 %v1105_v30, %v2468_v4  ;;  %v1149_v26 = vadd.f32 %v1145_v27, %v2471_v5  ;;  %v1116_v34 = vadd.f32 %v2624_v50, %v1108_v23  ;;  %v2625_v14 = vld [vmem:[#allocation9_spill] sm:$0xff] }
 0x1e9   :  { %v1053_v40 = vadd.f32 %v1049_v8, %v2438_v21  ;;  %v724_v29 = vpop.f32.mrb[14].mxu0  ;;  %1744 = vmatprep.subr.bf16.mxu0 %v1743_v17  ;;  %v1156_v37 = vadd.f32 %v1152_v44, %v1148_v46  ;;  %v2542_v53 = vadd.f32 %v1185_v20, %v2482_v36  ;;  %v2626_v46 = vld [vmem:[#allocation12_spill] sm:$0xff] }
 0x1ea   :  { %v1034_v15 = vmul.f32 %v2354_v10, %v724_v29  ;;  %v1106_v39 = vmul.f32 %v1102_v22, %v724_v29  ;;  %v1146_v33 = vmul.f32 %v1142_v57, %v724_v29  ;;  %v726_v52 = vpop.f32.mrb[15].mxu0  ;;  %1746 = vmatpush1.bf16.msra.mxu0 %v1745_v59  ;;  %v1117_v4 = vadd.f32 %v2625_v14, %v1109_v47 }
 0x1eb   :  { %v1050_v5 = vmul.f32 %v2354_v10, %v726_v52  ;;  %v1154_v45 = vmul.f32 %v2391_v9, %v726_v52  ;;  %v1186_v55 = vmul.f32 %v1182_v41, %v726_v52  ;;  %v1157_v21 = vadd.f32 %v1153_v24, %v1149_v26 }
 0x1ec   :  { %v1038_v11 = vadd.f32 %v1034_v15, %v2453_v28  ;;  %v1110_v58 = vadd.f32 %v1106_v39, %v2485_v56  ;;  %v1150_v36 = vadd.f32 %v1146_v33, %v2488_v61  ;;  %v795_v1 = vpop.f32.mrb[8].mxu1 }
 0x1ed   :  { %v1054_v44 = vadd.f32 %v1050_v5, %v2456_v7  ;;  %v1079_v43 = vmul.f32 %v2274_v63, %v795_v1  ;;  %v797_v48 = vpop.f32.mrb[9].mxu1  ;;  %v2554_v0 = vadd.f32 %v1186_v55, %v2493_v60 }
 0x1ee   :  { %v1119_v23 = vmul.f32 %v2274_v63, %v797_v48  ;;  %v1749_v9 = vpack.c.bf16 %v1038_v11, %v1037_v31  ;;  %v1118_v22 = vadd.f32 %v2626_v46, %v1110_v58  ;;  %v1158_v42 = vadd.f32 %v1154_v45, %v1150_v36 }
 0x1ef   :  { %v1083_v28 = vadd.f32 %v1079_v43, %v2476_v25  ;;  %v1747_v56 = vpack.c.bf16 %v1054_v44, %v1053_v40 }
 0x1f0   :  { %v1123_v18 = vadd.f32 %v1119_v23, %v1115_v49  ;;  %v801_v61 = vpop.f32.mrb[10].mxu1  ;;  %v884_v2 = vpop.f32.mrb[16].mxu0 }
 0x1f1   :  { %v1080_v7 = vmul.f32 %v2295_v51, %v801_v61  ;;  %v1159_v57 = vmul.f32 %v2274_v63, %v884_v2  ;;  %v803_v41 = vpop.f32.mrb[11].mxu1  ;;  %v886_v54 = vpop.f32.mrb[17].mxu0  ;;  %1748 = vmatprep.subr.bf16.mxu0 %v1747_v56 }
 0x1f2   :  { %v1120_v60 = vmul.f32 %v2295_v51, %v803_v41  ;;  %v1191_v30 = vmul.f32 %v2274_v63, %v886_v54  ;;  %1750 = vmatpush1.bf16.msra.mxu0 %v1749_v9 }
 0x1f3   :  { %v1084_v27 = vadd.f32 %v1080_v7, %v2480_v38  ;;  %v1163_v25 = vadd.f32 %v1159_v57, %v2522_v6 }
 0x1f4   :  { %v1124_v32 = vadd.f32 %v1120_v60, %v1116_v34  ;;  %v1195_v49 = vadd.f32 %v1191_v30, %v2516_v62  ;;  %v807_v59 = vpop.f32.mrb[12].mxu1  ;;  %v890_v8 = vpop.f32.mrb[18].mxu0 }
 0x1f5   :  { %v1753_v24 = vpack.c.bf16 %v1084_v27, %v1083_v28  ;;  %v1081_v20 = vmul.f32 %v2326_v35, %v807_v59  ;;  %v1160_v17 = vmul.f32 %v2295_v51, %v890_v8  ;;  %v809_v31 = vpop.f32.mrb[13].mxu1  ;;  %v892_v47 = vpop.f32.mrb[19].mxu0  ;;  %1684 = vmatmul.mubr.msk.f32.vlgmr.msra.gmra.mrb[24].mxu0 %vm449_vm0, %v2410_v13 }
 0x1f6   :  { %v1121_v63 = vmul.f32 %v2326_v35, %v809_v31  ;;  %v1192_v38 = vmul.f32 %v2295_v51, %v892_v47  ;;  %v1751_v6 = vpack.c.bf16 %v1124_v32, %v1123_v18  ;;  %1595 = vmatprep.mubr.f32.mxu0 %v2619_v12 }
 0x1f7   :  { %v1085_v62 = vadd.f32 %v1081_v20, %v2491_v3  ;;  %v1164_v26 = vadd.f32 %v1160_v17, %v1156_v37 }
 0x1f8   :  { %v1125_v50 = vadd.f32 %v1121_v63, %v1117_v4  ;;  %v1196_v34 = vadd.f32 %v1192_v38, %v2531_v19  ;;  %v813_v40 = vpop.f32.mrb[14].mxu1  ;;  %v896_v29 = vpop.f32.mrb[20].mxu0  ;;  %1752 = vmatprep.subr.bf16.mxu1 %v1751_v6 }
 0x1f9   :  { %v1761_v15 = vpack.c.bf16 %v1164_v26, %v1163_v25  ;;  %v1082_v39 = vmul.f32 %v2354_v10, %v813_v40  ;;  %v1161_v33 = vmul.f32 %v2326_v35, %v896_v29  ;;  %v815_v52 = vpop.f32.mrb[15].mxu1  ;;  %v898_v14 = vpop.f32.mrb[21].mxu0  ;;  %1754 = vmatpush1.bf16.msra.mxu1 %v1753_v24 }
 0x1fa   :  { %v1122_v51 = vmul.f32 %v2354_v10, %v815_v52  ;;  %v1193_v12 = vmul.f32 %v2326_v35, %v898_v14  ;;  %v1759_v3 = vpack.c.bf16 %v1196_v34, %v1195_v49 }
 0x1fb   :  { %v1086_v37 = vadd.f32 %v1082_v39, %v2495_v16  ;;  %v1165_v4 = vadd.f32 %v1161_v33, %v1157_v21 }
 0x1fc   :  { %v1126_v19 = vadd.f32 %v1122_v51, %v1118_v22  ;;  %v1197_v5 = vadd.f32 %v1193_v12, %v2542_v53  ;;  %v902_v45 = vpop.f32.mrb[22].mxu0  ;;  %1760 = vmatprep.subr.bf16.mxu0 %v1759_v3  ;;  %v1608_v53 = vlaneseq }
 0x1fd   :  { %v1757_v55 = vpack.c.bf16 %v1086_v37, %v1085_v62  ;;  %v1162_v11 = vmul.f32 %v2354_v10, %v902_v45  ;;  %v904_v58 = vpop.f32.mrb[23].mxu0  ;;  %1762 = vmatpush1.bf16.msra.mxu0 %v1761_v15 }
 0x1fe   :  { %v1194_v36 = vmul.f32 %v2354_v10, %v904_v58  ;;  %v1755_v1 = vpack.c.bf16 %v1126_v19, %v1125_v50  ;;  %v1609_v21 = vshrl.u32 %v1608_v53, 7  ;;  %v1606_v10 = vpop.permute.xlu1 %1605 }
 0x1ff   :  { %v1166_v44 = vadd.f32 %v1162_v11, %v1158_v42 }
 0x200   :  { %v1198_v35 = vadd.f32 %v1194_v36, %v2554_v0  ;;  %1756 = vmatprep.subr.bf16.mxu1 %v1755_v1  ;;  %v1610_v48 = vsub.s32 0, %v1609_v21 }
 0x201   :  { %v1765_v43 = vpack.c.bf16 %v1166_v44, %v1165_v4  ;;  %1758 = vmatpush1.bf16.msra.mxu1 %v1757_v55 }
 0x202   :  { %v1763_v16 = vpack.c.bf16 %v1198_v35, %v1197_v5  ;;  %v1611_v23 = vrot.slane %v1606_v10, %v1610_v48 }
 0x204   :  { %1764 = vmatprep.subr.bf16.mxu0 %v1763_v16  ;;  %1685 = vmatmul.mubr.msk.f32.vlgmr.msra.gmra.mrb[20].mxu1 %vm449_vm0, %v2410_v13 }
 0x205   :  { %1766 = vmatpush1.bf16.msra.mxu0 %v1765_v43 }
 0x208   :  { %1686 = vmatmul.mubr.msk.f32.vlgmr.msra.gmra.mrb[26].mxu0 %vm449_vm0, %v2410_v13 }
 0x293   :  { %v1313_v9 = vpop.f32.mrb[16].mxu1 }
 0x294   :  { %v1612_v46 = vadd.f32 %v1611_v23, %v1313_v9  ;;  %v1315_v0 = vpop.f32.mrb[17].mxu1 }
 0x295   :  { %v1613_v22 = vsub.f32 0.0, %v1315_v0  ;;  %1643 = vst [vmem:[#allocation3 + $0x4] sm:$0x2] %v1315_v0  ;;  %v1622_v57 = vrot.slane %v1315_v0, 1 }
 0x296   :  { %1638 = vst [vmem:[#allocation3] sm:$0x1] %v1612_v46  ;;  %1645 = vst [vmem:[#allocation3 + $0x7] sm:$0x1] %v1612_v46 }
 0x297   :  { %1640 = vst [vmem:[#allocation3 + $0x2] sm:$0x1] %v1613_v22 }
 0x29f   :  { %v1384_v42 = vpop.f32.mrb[18].mxu1 }
 0x2a0   :  { %1639 = vst [vmem:[#allocation3 + $0x1] sm:$0x1] %v1384_v42  ;;  %1644 = vst [vmem:[#allocation3 + $0x5] sm:$0x2] %v1384_v42  ;;  %v1386_v28 = vpop.f32.mrb[19].mxu1  ;;  %v1632_v60 = vrot.slane %v1384_v42, 1 }
 0x2a1   :  { %v1614_v56 = vsub.f32 0.0, %v1386_v28 }
 0x2a3   :  { %v1628_v18 = vmul.f32 %v1614_v56, %v1384_v42 }
 0x2c8   :  { %v1455_v13 = vpop.f32.mrb[24].mxu0 }
 0x2c9   :  { %v1615_v61 = vsub.f32 0.0, %v1455_v13  ;;  %v1457_v2 = vpop.f32.mrb[25].mxu0  ;;  %v1618_v7 = vmul.f32 %v1455_v13, %v1384_v42 }
 0x2ca   :  { %v1619_v41 = vmul.f32 %v1613_v22, %v1457_v2 }
 0x2cb   :  { %v1629_v54 = vmul.f32 %v1615_v61, %v1613_v22 }
 0x2cc   :  { %v1620_v30 = vadd.f32 %v1619_v41, %v1618_v7 }
 0x2cd   :  { %v1630_v27 = vadd.f32 %v1629_v54, %v1628_v18 }
 0x2ce   :  { %v1624_v25 = vadd.f32 %v1622_v57, %v1620_v30 }
 0x2cf   :  { %v1634_v32 = vadd.f32 %v1632_v60, %v1630_v27 }
 0x2d7   :  { %v1526_v49 = vpop.f32.mrb[20].mxu1 }
 0x2d8   :  { %v1528_v59 = vpop.f32.mrb[21].mxu1  ;;  %v1616_v8 = vsub.f32 0.0, %v1526_v49 }
 0x2db   :  { %v1597_v24 = vpop.f32.mrb[26].mxu0 }
 0x2dc   :  { %v1617_v20 = vsub.f32 0.0, %v1597_v24  ;;  %v1599_v17 = vpop.f32.mrb[27].mxu0 }
 0x2dd   :  { %v1625_v31 = vadd.f32 %v1599_v17, %v1528_v59 }
 0x2de   :  { %v1635_v47 = vadd.f32 %v1617_v20, %v1616_v8 }
 0x2df   :  { %v1626_v63 = vmul.f32 0.01, %v1625_v31 }
 0x2e0   :  { %v1636_v38 = vmul.f32 0.01, %v1635_v47 }
 0x2e1   :  { %v1627_v6 = vsub.f32 %v1624_v25, %v1626_v63 }
 0x2e2   :  { %v1637_v62 = vsub.f32 %v1634_v32, %v1636_v38 }
 0x2e3   :  { %1641 = vst [vmem:[#allocation3 + $0x3] sm:$0x1] %v1627_v6 }
 0x2e4   :  { %1642 = vst [vmem:[#allocation3 + $0x4] sm:$0x1] %v1637_v62 }
 0x2e5   :  { %1822 = shalt.err (!%p1819_p4)
}
 0x2e6   :  { %s1823_s17 = scalar_lea.hbm %s2607_s7, 128 }
 0x2e7   :  { %p1824_p5 = scmp.ne.s32.totalorder %s2607_s7, %s1823_s17  ;;  %p1827_p6 = scmp.lt.u32.totalorder %s1823_s17, %s2607_s7 }
 0x2e9   :  { %p1829_p7 = pnand %p1827_p6, %p1824_p5 }
 0x2eb   :  { %1832 = shalt.err (!%p1829_p7)
}
 0x2ec   :  { %1655 = dma.vmem_to_hbm [thread:$0]  %s1653_s13, 128, %s2607_s7, [#allocation4]  }
 0x2ed   :  { %1833 = dma.done.wait [#allocation4], 128  }
 0x2ee   :  { %1834 = vsyncadd [#allocation4], 4294967168 }
 0x2ef   :  { %1659 = vsyncpa [#allocation4], 1 }

</bundles_post_ra>
